<compile_context>
chip_gen: v7x
topology: tpu7x:2x2x1
jax: 0.10.0
libtpu: 0.0.40
codegen_flags: <defaults>
</compile_context>

<pallas_src>
import jax
import jax.numpy as jnp
from jax.experimental import pallas as pl
from jax.experimental.pallas import tpu as pltpu

IN_F = 28 * 28      # 784
IN_PAD = 896        # 7 * 128, lane-aligned K for layer 1 (zero-padded cols)
HIDDEN = 512
OUT_F = 10
OUT_PAD = 128       # lane-dense output store, sliced back to 10 in wrapper
TILE_B = 128        # batch tile: MXU-row aligned


def mlp_kernel(x_ref, w1_ref, b1_ref, w2_ref, b2_ref, w3_ref, b3_ref, o_ref):
    # Layer 1: (TB, 896)bf16 @ (896, 512)bf16 -> f32 acc, +bias, ReLU
    h1 = jnp.dot(x_ref[...], w1_ref[...], preferred_element_type=jnp.float32)
    h1 = jnp.maximum(h1 + b1_ref[...], 0.0).astype(jnp.bfloat16)
    # Layer 2: (TB, 512) @ (512, 512)
    h2 = jnp.dot(h1, w2_ref[...], preferred_element_type=jnp.float32)
    h2 = jnp.maximum(h2 + b2_ref[...], 0.0).astype(jnp.bfloat16)
    # Layer 3: (TB, 512) @ (512, 128)  (output dim zero-padded 10 -> 128)
    logits = jnp.dot(h2, w3_ref[...], preferred_element_type=jnp.float32)
    o_ref[...] = (logits + b3_ref[...]).astype(o_ref.dtype)


@jax.jit
def mlp_forward(x, params):
    """x: (B, 1, 28, 28) float32. Returns logits (B, 10) float32."""
    w1, b1, w2, b2, w3, b3 = params
    B = x.shape[0]
    x_flat = x.reshape(B, IN_F)                      # nn.Flatten()

    # Pad batch to a multiple of TILE_B; pad K/N dims to lane multiples;
    # cast weights / input to bf16 (accumulation stays f32 inside the kernel).
    B_pad = ((B + TILE_B - 1) // TILE_B) * TILE_B
    x_p = jnp.pad(x_flat, ((0, B_pad - B), (0, IN_PAD - IN_F))).astype(jnp.bfloat16)
    w1_p = jnp.pad(w1, ((0, IN_PAD - IN_F), (0, 0))).astype(jnp.bfloat16)
    w2_p = w2.astype(jnp.bfloat16)
    w3_p = jnp.pad(w3, ((0, 0), (0, OUT_PAD - OUT_F))).astype(jnp.bfloat16)
    b3_p = jnp.pad(b3, ((0, 0), (0, OUT_PAD - OUT_F)))

    n_tiles = B_pad // TILE_B
    resident = lambda i: (0, 0)   # same block every grid step => single DMA, stays in VMEM

    flops = 2 * B_pad * (IN_PAD * HIDDEN + HIDDEN * HIDDEN + HIDDEN * OUT_PAD)
    bytes_accessed = (
        x_p.size * 2 + w1_p.size * 2 + w2_p.size * 2 + w3_p.size * 2
        + b1.size * 4 + b2.size * 4 + b3_p.size * 4
        + B_pad * OUT_PAD * 4
    )

    out = pl.pallas_call(
        mlp_kernel,
        out_shape=jax.ShapeDtypeStruct((B_pad, OUT_PAD), jnp.float32),
        grid_spec=pltpu.PrefetchScalarGridSpec(
            num_scalar_prefetch=0,
            grid=(n_tiles,),
            in_specs=[
                pl.BlockSpec((TILE_B, IN_PAD), lambda i: (i, 0)),   # x tile
                pl.BlockSpec((IN_PAD, HIDDEN), resident),           # w1
                pl.BlockSpec((1, HIDDEN), resident),                # b1
                pl.BlockSpec((HIDDEN, HIDDEN), resident),           # w2
                pl.BlockSpec((1, HIDDEN), resident),                # b2
                pl.BlockSpec((HIDDEN, OUT_PAD), resident),          # w3 (padded)
                pl.BlockSpec((1, OUT_PAD), resident),               # b3 (padded)
            ],
            out_specs=pl.BlockSpec((TILE_B, OUT_PAD), lambda i: (i, 0)),
        ),
        compiler_params=pltpu.CompilerParams(
            dimension_semantics=("parallel",),   # megacore: split batch tiles across TCs
        ),
        cost_estimate=pl.CostEstimate(
            flops=flops, transcendentals=0, bytes_accessed=bytes_accessed),
    )(x_p, w1_p, b1, w2_p, b2, w3_p, b3_p)

    return out[:B, :OUT_F]


def init_params(key):
    """PyTorch-style uniform(-1/sqrt(fan_in), 1/sqrt(fan_in)) init.
    Weights stored as (in_features, out_features); biases as (1, out_features)."""
    dims = [(IN_F, HIDDEN), (HIDDEN, HIDDEN), (HIDDEN, OUT_F)]
    params = []
    for (fan_in, fan_out) in dims:
        key, kw, kb = jax.random.split(key, 3)
        bound = 1.0 / jnp.sqrt(float(fan_in))
        w = jax.random.uniform(kw, (fan_in, fan_out), jnp.float32, -bound, bound)
        b = jax.random.uniform(kb, (1, fan_out), jnp.float32, -bound, bound)
        params += [w, b]
    return tuple(params)


if __name__ == "__main__":
    key = jax.random.PRNGKey(0)
    key, kx = jax.random.split(key)

    B = 8
    x = jax.random.normal(kx, (B, 1, 28, 28), jnp.float32)
    params = init_params(key)

    logits = mlp_forward(x, params)
    jax.block_until_ready(logits)

    assert logits.shape == (B, OUT_F) and logits.dtype == jnp.float32

    # pure-JAX f32 reference (kernel uses bf16 weights/activations with f32
    # accumulation, so tolerance is loosened accordingly)
    w1, b1, w2, b2, w3, b3 = params
    xf = x.reshape(B, -1)
    ref = jnp.maximum(xf @ w1 + b1, 0.0)
    ref = jnp.maximum(ref @ w2 + b2, 0.0)
    ref = ref @ w3 + b3
    assert jnp.allclose(logits, ref, atol=5e-2, rtol=5e-2), (
        jnp.max(jnp.abs(logits - ref)))

    print("KERNEL_OK")
</pallas_src>

<mosaic_0001>
module attributes {stable_mosaic.version = 11 : i64} {
  func.func @mlp_kernel(%arg0: i32, %arg1: memref<128x896xbf16, #tpu.memory_space<vmem>>, %arg2: memref<896x512xbf16, #tpu.memory_space<vmem>>, %arg3: memref<1x512xf32, #tpu.memory_space<vmem>>, %arg4: memref<512x512xbf16, #tpu.memory_space<vmem>>, %arg5: memref<1x512xf32, #tpu.memory_space<vmem>>, %arg6: memref<512x128xbf16, #tpu.memory_space<vmem>>, %arg7: memref<1x128xf32, #tpu.memory_space<vmem>>, %arg8: memref<128x128xf32, #tpu.memory_space<vmem>>) attributes {dimension_semantics = [#tpu.dimension_semantics<parallel>], iteration_bounds = array<i64: 1>, scalar_prefetch = 0 : i64, scratch_operands = 0 : i64, tpu.core_type = #tpu.core_type<tc>, window_params = [{transform_indices = @transform_0, window_bounds = array<i64: 128, 896>}, {pipeline_mode = #tpu.pipeline_mode<synchronous>, transform_indices = @transform_1, window_bounds = array<i64: 896, 512>}, {pipeline_mode = #tpu.pipeline_mode<synchronous>, transform_indices = @transform_2, window_bounds = array<i64: 1, 512>}, {pipeline_mode = #tpu.pipeline_mode<synchronous>, transform_indices = @transform_3, window_bounds = array<i64: 512, 512>}, {pipeline_mode = #tpu.pipeline_mode<synchronous>, transform_indices = @transform_4, window_bounds = array<i64: 1, 512>}, {pipeline_mode = #tpu.pipeline_mode<synchronous>, transform_indices = @transform_5, window_bounds = array<i64: 512, 128>}, {pipeline_mode = #tpu.pipeline_mode<synchronous>, transform_indices = @transform_6, window_bounds = array<i64: 1, 128>}, {transform_indices = @transform_7, window_bounds = array<i64: 128, 128>}]} {
    %c0 = arith.constant 0 : index
    %c0_0 = arith.constant 0 : index
    %0 = vector.load %arg1[%c0, %c0_0] : memref<128x896xbf16, #tpu.memory_space<vmem>>, vector<128x896xbf16>
    %c0_1 = arith.constant 0 : index
    %c0_2 = arith.constant 0 : index
    %1 = vector.load %arg2[%c0_1, %c0_2] : memref<896x512xbf16, #tpu.memory_space<vmem>>, vector<896x512xbf16>
    %cst = arith.constant dense<0.000000e+00> : vector<128x512xf32>
    %2 = tpu.matmul %0, %1, %cst {dimension_numbers = #tpu.dot_dimension_numbers<[1], [0], [0], [1], [0, 0, 1, 1], [], []>} : vector<128x896xbf16>, vector<896x512xbf16>, vector<128x512xf32> -> vector<128x512xf32>
    %c0_3 = arith.constant 0 : index
    %c0_4 = arith.constant 0 : index
    %3 = vector.load %arg3[%c0_3, %c0_4] : memref<1x512xf32, #tpu.memory_space<vmem>>, vector<1x512xf32>
    %4 = vector.broadcast %3 : vector<1x512xf32> to vector<128x512xf32>
    %5 = arith.addf %2, %4 : vector<128x512xf32>
    %cst_5 = arith.constant 0.000000e+00 : f32
    %6 = vector.broadcast %cst_5 : f32 to vector<128x512xf32>
    %7 = arith.maximumf %5, %6 : vector<128x512xf32>
    %8 = arith.truncf %7 : vector<128x512xf32> to vector<128x512xbf16>
    %c0_6 = arith.constant 0 : index
    %c0_7 = arith.constant 0 : index
    %9 = vector.load %arg4[%c0_6, %c0_7] : memref<512x512xbf16, #tpu.memory_space<vmem>>, vector<512x512xbf16>
    %cst_8 = arith.constant dense<0.000000e+00> : vector<128x512xf32>
    %10 = tpu.matmul %8, %9, %cst_8 {dimension_numbers = #tpu.dot_dimension_numbers<[1], [0], [0], [1], [0, 0, 1, 1], [], []>} : vector<128x512xbf16>, vector<512x512xbf16>, vector<128x512xf32> -> vector<128x512xf32>
    %c0_9 = arith.constant 0 : index
    %c0_10 = arith.constant 0 : index
    %11 = vector.load %arg5[%c0_9, %c0_10] : memref<1x512xf32, #tpu.memory_space<vmem>>, vector<1x512xf32>
    %12 = vector.broadcast %11 : vector<1x512xf32> to vector<128x512xf32>
    %13 = arith.addf %10, %12 : vector<128x512xf32>
    %cst_11 = arith.constant 0.000000e+00 : f32
    %14 = vector.broadcast %cst_11 : f32 to vector<128x512xf32>
    %15 = arith.maximumf %13, %14 : vector<128x512xf32>
    %16 = arith.truncf %15 : vector<128x512xf32> to vector<128x512xbf16>
    %c0_12 = arith.constant 0 : index
    %c0_13 = arith.constant 0 : index
    %17 = vector.load %arg6[%c0_12, %c0_13] : memref<512x128xbf16, #tpu.memory_space<vmem>>, vector<512x128xbf16>
    %cst_14 = arith.constant dense<0.000000e+00> : vector<128x128xf32>
    %18 = tpu.matmul %16, %17, %cst_14 {dimension_numbers = #tpu.dot_dimension_numbers<[1], [0], [0], [1], [0, 0, 1, 1], [], []>} : vector<128x512xbf16>, vector<512x128xbf16>, vector<128x128xf32> -> vector<128x128xf32>
    %c0_15 = arith.constant 0 : index
    %c0_16 = arith.constant 0 : index
    %19 = vector.load %arg7[%c0_15, %c0_16] : memref<1x128xf32, #tpu.memory_space<vmem>>, vector<1x128xf32>
    %20 = vector.broadcast %19 : vector<1x128xf32> to vector<128x128xf32>
    %21 = arith.addf %18, %20 : vector<128x128xf32>
    %c0_17 = arith.constant 0 : index
    %c0_18 = arith.constant 0 : index
    %22 = vector.load %arg8[%c0_17, %c0_18] : memref<128x128xf32, #tpu.memory_space<vmem>>, vector<128x128xf32>
    tpu.vector_store %arg8[%c0_17, %c0_18], %21 {strides = array<i32>} : memref<128x128xf32, #tpu.memory_space<vmem>>, vector<128x128xf32>,
    return
  }
  func.func @transform_0(%arg0: i32) -> (i32, i32) {
    %c0_i32 = arith.constant 0 : i32
    %c0_i32_0 = arith.constant 0 : i32
    return %arg0, %c0_i32 : i32, i32
  }
  func.func @transform_1(%arg0: i32) -> (i32, i32) {
    %c0_i32 = arith.constant 0 : i32
    %c0_i32_0 = arith.constant 0 : i32
    %c0_i32_1 = arith.constant 0 : i32
    return %c0_i32, %c0_i32_0 : i32, i32
  }
  func.func @transform_2(%arg0: i32) -> (i32, i32) {
    %c0_i32 = arith.constant 0 : i32
    %c0_i32_0 = arith.constant 0 : i32
    %c0_i32_1 = arith.constant 0 : i32
    return %c0_i32, %c0_i32_0 : i32, i32
  }
  func.func @transform_3(%arg0: i32) -> (i32, i32) {
    %c0_i32 = arith.constant 0 : i32
    %c0_i32_0 = arith.constant 0 : i32
    %c0_i32_1 = arith.constant 0 : i32
    return %c0_i32, %c0_i32_0 : i32, i32
  }
  func.func @transform_4(%arg0: i32) -> (i32, i32) {
    %c0_i32 = arith.constant 0 : i32
    %c0_i32_0 = arith.constant 0 : i32
    %c0_i32_1 = arith.constant 0 : i32
    return %c0_i32, %c0_i32_0 : i32, i32
  }
  func.func @transform_5(%arg0: i32) -> (i32, i32) {
    %c0_i32 = arith.constant 0 : i32
    %c0_i32_0 = arith.constant 0 : i32
    %c0_i32_1 = arith.constant 0 : i32
    return %c0_i32, %c0_i32_0 : i32, i32
  }
  func.func @transform_6(%arg0: i32) -> (i32, i32) {
    %c0_i32 = arith.constant 0 : i32
    %c0_i32_0 = arith.constant 0 : i32
    %c0_i32_1 = arith.constant 0 : i32
    return %c0_i32, %c0_i32_0 : i32, i32
  }
  func.func @transform_7(%arg0: i32) -> (i32, i32) {
    %c0_i32 = arith.constant 0 : i32
    %c0_i32_0 = arith.constant 0 : i32
    return %arg0, %c0_i32 : i32, i32
  }
}

</mosaic_0001>

<bundles_post_ra>
// kernel: mlp_forward.1
= control target key start
LH: loop header
LB: loop body
LE: loop exit
PB: predicated region body
PF: predicated region fallthrough
CT: control target
= control target key end

     0   :  { %s7836_s1 = inlined_call_operand.vmem [shape: bf16[896,512], index: 1, kind: input, shape index: {}]   ;;  %s7837_s0 = inlined_call_operand.vmem [shape: bf16[128,896], index: 0, kind: input, shape index: {}]   ;;  %s7838_s3 = inlined_call_operand.vmem [shape: bf16[512,512], index: 3, kind: input, shape index: {}]   ;;  %s7839_s2 = inlined_call_operand.vmem [shape: f32[1,512], index: 2, kind: input, shape index: {}]   ;;  %s7840_s5 = inlined_call_operand.vmem [shape: bf16[512,128], index: 5, kind: input, shape index: {}]   ;;  %s7841_s4 = inlined_call_operand.vmem [shape: f32[1,512], index: 4, kind: input, shape index: {}]   ;;  %s7842_s6 = inlined_call_operand.vmem [shape: f32[1,128], index: 6, kind: input, shape index: {}]   ;;  %s7843_s7 = inlined_call_operand.vmem [shape: f32[128,128], index: 7, kind: output, shape index: {}]  }
   0x1   :  { %v5514_v0 = vld [vmem:[%s7836_s1 + $0x4] ss:$16 sps:$4 sm:$0xff]   ;;  %v5516_v1 = vld [vmem:[%s7836_s1 + $0xc] ss:$16 sps:$4 sm:$0xff]   ;;  %v5518_v2 = vld [vmem:[%s7836_s1] ss:$16 sps:$4 sm:$0xff]  }
   0x2   :  { %1745 = vmatprep.subr.bf16.mxu0 %v5514_v0  ;;  %v5519_v3 = vld [vmem:[%s7836_s1 + $0x8] ss:$16 sps:$4 sm:$0xff]   ;;  %2197 = vmatprep.subr.bf16.mxu1 %v5516_v1  ;;  %v5520_v4 = vld [vmem:[%s7836_s1 + $0x24] ss:$16 sps:$4 sm:$0xff]   ;;  %v5522_v5 = vld [vmem:[%s7836_s1 + $0x2c] ss:$16 sps:$4 sm:$0xff]  }
   0x3   :  { %1746 = vmatpush1.bf16.msra.mxu0 %v5518_v2  ;;  %2198 = vmatpush1.bf16.msra.mxu1 %v5519_v3  ;;  %v5524_v6 = vld [vmem:[%s7836_s1 + $0x20] ss:$16 sps:$4 sm:$0xff]   ;;  %v5525_v7 = vld [vmem:[%s7836_s1 + $0x28] ss:$16 sps:$4 sm:$0xff]   ;;  %v5526_v8 = vld [vmem:[%s7836_s1 + $0x44] ss:$16 sps:$4 sm:$0xff]  }
   0x4   :  { %1747 = vmatprep.subr.bf16.mxu0 %v5520_v4  ;;  %2199 = vmatprep.subr.bf16.mxu1 %v5522_v5  ;;  %v5528_v9 = vld [vmem:[%s7836_s1 + $0x4c] ss:$16 sps:$4 sm:$0xff]   ;;  %v5530_v10 = vld [vmem:[%s7836_s1 + $0x40] ss:$16 sps:$4 sm:$0xff]   ;;  %v5531_v11 = vld [vmem:[%s7836_s1 + $0x48] ss:$16 sps:$4 sm:$0xff]  }
   0x5   :  { %v5532_v12 = vld [vmem:[%s7836_s1 + $0x64] ss:$16 sps:$4 sm:$0xff]   ;;  %v5534_v13 = vld [vmem:[%s7836_s1 + $0x6c] ss:$16 sps:$4 sm:$0xff]   ;;  %v5536_v14 = vld [vmem:[%s7836_s1 + $0x60] ss:$16 sps:$4 sm:$0xff]  }
   0x6   :  { %v5537_v15 = vld [vmem:[%s7836_s1 + $0x68] ss:$16 sps:$4 sm:$0xff]   ;;  %v5538_v16 = vld [vmem:[%s7836_s1 + $0x84] ss:$16 sps:$4 sm:$0xff]   ;;  %v5540_v17 = vld [vmem:[%s7836_s1 + $0x8c] ss:$16 sps:$4 sm:$0xff]  }
   0x7   :  { %1748 = vmatpush1.bf16.msra.mxu0 %v5524_v6  ;;  %2200 = vmatpush1.bf16.msra.mxu1 %v5525_v7  ;;  %v5542_v18 = vld [vmem:[%s7836_s1 + $0x80] ss:$16 sps:$4 sm:$0xff]   ;;  %v5543_v19 = vld [vmem:[%s7836_s1 + $0x88] ss:$16 sps:$4 sm:$0xff]   ;;  %v5544_v20 = vld [vmem:[%s7836_s1 + $0xa4] ss:$16 sps:$4 sm:$0xff]  }
   0x8   :  { %1749 = vmatprep.subr.bf16.mxu0 %v5526_v8  ;;  %2201 = vmatprep.subr.bf16.mxu1 %v5528_v9  ;;  %v5546_v21 = vld [vmem:[%s7836_s1 + $0xac] ss:$16 sps:$4 sm:$0xff]   ;;  %v5548_v22 = vld [vmem:[%s7836_s1 + $0xa0] ss:$16 sps:$4 sm:$0xff]   ;;  %v5549_v23 = vld [vmem:[%s7836_s1 + $0xa8] ss:$16 sps:$4 sm:$0xff]  }
   0x9   :  { %v5550_v24 = vld [vmem:[%s7836_s1 + $0xc4] ss:$16 sps:$4 sm:$0xff]   ;;  %v5552_v25 = vld [vmem:[%s7836_s1 + $0xcc] ss:$16 sps:$4 sm:$0xff]   ;;  %v5554_v26 = vld [vmem:[%s7836_s1 + $0xc0] ss:$16 sps:$4 sm:$0xff]  }
   0xa   :  { %v5555_v27 = vld [vmem:[%s7836_s1 + $0xc8] ss:$16 sps:$4 sm:$0xff]   ;;  %v5556_v28 = vld [vmem:[%s7836_s1 + $0xe4] ss:$16 sps:$4 sm:$0xff]   ;;  %v5558_v29 = vld [vmem:[%s7836_s1 + $0xec] ss:$16 sps:$4 sm:$0xff]  }
   0xb   :  { %1750 = vmatpush1.bf16.msra.mxu0 %v5530_v10  ;;  %2202 = vmatpush1.bf16.msra.mxu1 %v5531_v11  ;;  %v5560_v30 = vld [vmem:[%s7836_s1 + $0xe0] ss:$16 sps:$4 sm:$0xff]   ;;  %v5561_v31 = vld [vmem:[%s7836_s1 + $0xe8] ss:$16 sps:$4 sm:$0xff]   ;;  %v5562_v32 = vld [vmem:[%s7836_s1 + $0x104] ss:$16 sps:$4 sm:$0xff]  }
   0xc   :  { %1751 = vmatprep.subr.bf16.mxu0 %v5532_v12  ;;  %2203 = vmatprep.subr.bf16.mxu1 %v5534_v13  ;;  %v5564_v33 = vld [vmem:[%s7836_s1 + $0x10c] ss:$16 sps:$4 sm:$0xff]   ;;  %v5566_v34 = vld [vmem:[%s7836_s1 + $0x100] ss:$16 sps:$4 sm:$0xff]   ;;  %v5567_v35 = vld [vmem:[%s7836_s1 + $0x108] ss:$16 sps:$4 sm:$0xff]  }
   0xd   :  { %v5568_v36 = vld [vmem:[%s7836_s1 + $0x124] ss:$16 sps:$4 sm:$0xff]   ;;  %v5570_v37 = vld [vmem:[%s7836_s1 + $0x12c] ss:$16 sps:$4 sm:$0xff]   ;;  %v5572_v38 = vld [vmem:[%s7836_s1 + $0x120] ss:$16 sps:$4 sm:$0xff]  }
   0xe   :  { %v5573_v39 = vld [vmem:[%s7836_s1 + $0x128] ss:$16 sps:$4 sm:$0xff]   ;;  %v5574_v40 = vld [vmem:[%s7836_s1 + $0x144] ss:$16 sps:$4 sm:$0xff]   ;;  %v5576_v41 = vld [vmem:[%s7836_s1 + $0x14c] ss:$16 sps:$4 sm:$0xff]  }
   0xf   :  { %1752 = vmatpush1.bf16.msra.mxu0 %v5536_v14  ;;  %2204 = vmatpush1.bf16.msra.mxu1 %v5537_v15  ;;  %v5578_v42 = vld [vmem:[%s7836_s1 + $0x140] ss:$16 sps:$4 sm:$0xff]   ;;  %v5579_v43 = vld [vmem:[%s7836_s1 + $0x148] ss:$16 sps:$4 sm:$0xff]   ;;  %v5580_v44 = vld [vmem:[%s7836_s1 + $0x164] ss:$16 sps:$4 sm:$0xff]  }
  0x10   :  { %1753 = vmatprep.subr.bf16.mxu0 %v5538_v16  ;;  %2205 = vmatprep.subr.bf16.mxu1 %v5540_v17  ;;  %v5582_v45 = vld [vmem:[%s7836_s1 + $0x16c] ss:$16 sps:$4 sm:$0xff]   ;;  %v5584_v46 = vld [vmem:[%s7836_s1 + $0x160] ss:$16 sps:$4 sm:$0xff]   ;;  %v5585_v47 = vld [vmem:[%s7836_s1 + $0x168] ss:$16 sps:$4 sm:$0xff]  }
  0x11   :  { %v5612_v48 = vld [vmem:[%s7837_s0 + $0x4] ss:$28 sps:$4 sm:$0xff]   ;;  %v5588_v50 = vld [vmem:[%s7836_s1 + $0x18c] ss:$16 sps:$4 sm:$0xff]   ;;  %v5591_v52 = vld [vmem:[%s7836_s1 + $0x188] ss:$16 sps:$4 sm:$0xff]  }
  0x12   :  { %v5586_v49 = vld [vmem:[%s7836_s1 + $0x184] ss:$16 sps:$4 sm:$0xff]   ;;  %1777 = vmatprep.mubr.bf16.mxu0 %v5612_v48  ;;  %2229 = vmatprep.mubr.bf16.mxu1 %v5612_v48  ;;  %v5590_v51 = vld [vmem:[%s7836_s1 + $0x180] ss:$16 sps:$4 sm:$0xff]   ;;  %v5594_v54 = vld [vmem:[%s7836_s1 + $0x1ac] ss:$16 sps:$4 sm:$0xff]  }
  0x13   :  { %1754 = vmatpush1.bf16.msra.mxu0 %v5542_v18  ;;  %2206 = vmatpush1.bf16.msra.mxu1 %v5543_v19  ;;  %v5592_v53 = vld [vmem:[%s7836_s1 + $0x1a4] ss:$16 sps:$4 sm:$0xff]   ;;  %v5596_v55 = vld [vmem:[%s7836_s1 + $0x1a0] ss:$16 sps:$4 sm:$0xff]   ;;  %v5597_v56 = vld [vmem:[%s7836_s1 + $0x1a8] ss:$16 sps:$4 sm:$0xff]  }
  0x14   :  { %1755 = vmatprep.subr.bf16.mxu0 %v5544_v20  ;;  %2207 = vmatprep.subr.bf16.mxu1 %v5546_v21  ;;  %v5598_v57 = vld [vmem:[%s7836_s1 + $0x1c4] ss:$16 sps:$4 sm:$0xff]   ;;  %v5600_v58 = vld [vmem:[%s7836_s1 + $0x1cc] ss:$16 sps:$4 sm:$0xff]   ;;  %v5602_v59 = vld [vmem:[%s7836_s1 + $0x1c0] ss:$16 sps:$4 sm:$0xff]  }
  0x15   :  { %v5603_v60 = vld [vmem:[%s7836_s1 + $0x1c8] ss:$16 sps:$4 sm:$0xff]   ;;  %v5604_v61 = vld [vmem:[%s7836_s1 + $0x1e4] ss:$16 sps:$4 sm:$0xff]   ;;  %v5606_v62 = vld [vmem:[%s7836_s1 + $0x1ec] ss:$16 sps:$4 sm:$0xff]  }
  0x16   :  { %v5608_v63 = vld [vmem:[%s7836_s1 + $0x1e0] ss:$16 sps:$4 sm:$0xff]   ;;  %v5609_v0 = vld [vmem:[%s7836_s1 + $0x1e8] ss:$16 sps:$4 sm:$0xff]   ;;  %v5615_v1 = vld [vmem:[%s7836_s1 + $0x204] ss:$16 sps:$4 sm:$0xff]  }
  0x17   :  { %1756 = vmatpush1.bf16.msra.mxu0 %v5548_v22  ;;  %2208 = vmatpush1.bf16.msra.mxu1 %v5549_v23  ;;  %v5618_v2 = vld [vmem:[%s7836_s1 + $0x20c] ss:$16 sps:$4 sm:$0xff]   ;;  %v5613_v4 = vld [vmem:[%s7836_s1 + $0x200] ss:$16 sps:$4 sm:$0xff]   ;;  %v5616_v5 = vld [vmem:[%s7836_s1 + $0x208] ss:$16 sps:$4 sm:$0xff]  }
  0x18   :  { %1757 = vmatprep.subr.bf16.mxu0 %v5550_v24  ;;  %2209 = vmatprep.subr.bf16.mxu1 %v5552_v25  ;;  %v5610_v3 = vld [vmem:[%s7837_s0] ss:$28 sps:$4 sm:$0xff]   ;;  %v5621_v6 = vld [vmem:[%s7836_s1 + $0x224] ss:$16 sps:$4 sm:$0xff]   ;;  %v5622_v10 = vld [vmem:[%s7836_s1 + $0x228] ss:$16 sps:$4 sm:$0xff]  }
  0x19   :  { %v5624_v7 = vld [vmem:[%s7836_s1 + $0x22c] ss:$16 sps:$4 sm:$0xff]   ;;  %v5619_v9 = vld [vmem:[%s7836_s1 + $0x220] ss:$16 sps:$4 sm:$0xff]   ;;  %v5630_v11 = vld [vmem:[%s7836_s1 + $0x244] ss:$16 sps:$4 sm:$0xff]  }
  0x1a   :  { %v5625_v8 = vld [vmem:[%s7837_s0 + $0x3c] ss:$28 sps:$4 sm:$0xff]   ;;  %v5628_v14 = vld [vmem:[%s7836_s1 + $0x240] ss:$16 sps:$4 sm:$0xff]   ;;  %v5636_v16 = vld [vmem:[%s7836_s1 + $0x264] ss:$16 sps:$4 sm:$0xff]  }
  0x1b   :  { %1758 = vmatpush1.bf16.msra.mxu0 %v5554_v26  ;;  %2210 = vmatpush1.bf16.msra.mxu1 %v5555_v27  ;;  %v5633_v12 = vld [vmem:[%s7836_s1 + $0x24c] ss:$16 sps:$4 sm:$0xff]   ;;  %v5627_v13 = vld [vmem:[%s7837_s0 + $0x38] ss:$28 sps:$4 sm:$0xff]   ;;  %v5634_v19 = vld [vmem:[%s7836_s1 + $0x260] ss:$16 sps:$4 sm:$0xff]  }
  0x1c   :  { %1759 = vmatprep.subr.bf16.mxu0 %v5556_v28  ;;  %2211 = vmatprep.subr.bf16.mxu1 %v5558_v29  ;;  %v5631_v15 = vld [vmem:[%s7836_s1 + $0x248] ss:$16 sps:$4 sm:$0xff]   ;;  %v5639_v17 = vld [vmem:[%s7836_s1 + $0x26c] ss:$16 sps:$4 sm:$0xff]   ;;  %v5640_v18 = vld [vmem:[%s7837_s0 + $0x74] ss:$28 sps:$4 sm:$0xff]  }
  0x1d   :  { %v5637_v20 = vld [vmem:[%s7836_s1 + $0x268] ss:$16 sps:$4 sm:$0xff]   ;;  %v5645_v21 = vld [vmem:[%s7836_s1 + $0x284] ss:$16 sps:$4 sm:$0xff]   ;;  %v5648_v22 = vld [vmem:[%s7836_s1 + $0x28c] ss:$16 sps:$4 sm:$0xff]  }
  0x1e   :  { %v5642_v23 = vld [vmem:[%s7837_s0 + $0x70] ss:$28 sps:$4 sm:$0xff]   ;;  %v5646_v25 = vld [vmem:[%s7836_s1 + $0x288] ss:$16 sps:$4 sm:$0xff]   ;;  %v5651_v26 = vld [vmem:[%s7836_s1 + $0x2a4] ss:$16 sps:$4 sm:$0xff]  }
  0x1f   :  { %1760 = vmatpush1.bf16.msra.mxu0 %v5560_v30  ;;  %2212 = vmatpush1.bf16.msra.mxu1 %v5561_v31  ;;  %v5643_v24 = vld [vmem:[%s7836_s1 + $0x280] ss:$16 sps:$4 sm:$0xff]   ;;  %v5654_v27 = vld [vmem:[%s7836_s1 + $0x2ac] ss:$16 sps:$4 sm:$0xff]   ;;  %v5652_v30 = vld [vmem:[%s7836_s1 + $0x2a8] ss:$16 sps:$4 sm:$0xff]  }
  0x20   :  { %1761 = vmatprep.subr.bf16.mxu0 %v5562_v32  ;;  %2213 = vmatprep.subr.bf16.mxu1 %v5564_v33  ;;  %v5655_v28 = vld [vmem:[%s7837_s0 + $0xac] ss:$28 sps:$4 sm:$0xff]   ;;  %v5649_v29 = vld [vmem:[%s7836_s1 + $0x2a0] ss:$16 sps:$4 sm:$0xff]   ;;  %v5660_v31 = vld [vmem:[%s7836_s1 + $0x2c4] ss:$16 sps:$4 sm:$0xff]  }
  0x21   :  { %v5663_v32 = vld [vmem:[%s7836_s1 + $0x2cc] ss:$16 sps:$4 sm:$0xff]   ;;  %v5657_v33 = vld [vmem:[%s7837_s0 + $0xa8] ss:$28 sps:$4 sm:$0xff]  }
  0x22   :  { %v5685_v48 = vld [vmem:[%s7837_s0 + $0x11c] ss:$28 sps:$4 sm:$0xff]  }
  0x23   :  { %1762 = vmatpush1.bf16.msra.mxu0 %v5566_v34  ;;  %2214 = vmatpush1.bf16.msra.mxu1 %v5567_v35  ;;  %v5658_v34 = vld [vmem:[%s7836_s1 + $0x2c0] ss:$16 sps:$4 sm:$0xff]   ;;  %v5661_v35 = vld [vmem:[%s7836_s1 + $0x2c8] ss:$16 sps:$4 sm:$0xff]  }
  0x24   :  { %1763 = vmatprep.subr.bf16.mxu0 %v5568_v36  ;;  %2215 = vmatprep.subr.bf16.mxu1 %v5570_v37  ;;  %v5666_v36 = vld [vmem:[%s7836_s1 + $0x2e4] ss:$16 sps:$4 sm:$0xff]   ;;  %v5669_v37 = vld [vmem:[%s7836_s1 + $0x2ec] ss:$16 sps:$4 sm:$0xff]  }
  0x27   :  { %1764 = vmatpush1.bf16.msra.mxu0 %v5572_v38  ;;  %2216 = vmatpush1.bf16.msra.mxu1 %v5573_v39  ;;  %v5670_v38 = vld [vmem:[%s7837_s0 + $0xe4] ss:$28 sps:$4 sm:$0xff]  }
  0x28   :  { %1765 = vmatprep.subr.bf16.mxu0 %v5574_v40  ;;  %2217 = vmatprep.subr.bf16.mxu1 %v5576_v41  ;;  %v5664_v39 = vld [vmem:[%s7836_s1 + $0x2e0] ss:$16 sps:$4 sm:$0xff]   ;;  %v5667_v40 = vld [vmem:[%s7836_s1 + $0x2e8] ss:$16 sps:$4 sm:$0xff]   ;;  %v5675_v41 = vld [vmem:[%s7836_s1 + $0x304] ss:$16 sps:$4 sm:$0xff]  }
  0x2b   :  { %1766 = vmatpush1.bf16.msra.mxu0 %v5578_v42  ;;  %2218 = vmatpush1.bf16.msra.mxu1 %v5579_v43  ;;  %v5678_v42 = vld [vmem:[%s7836_s1 + $0x30c] ss:$16 sps:$4 sm:$0xff]  }
  0x2c   :  { %1767 = vmatprep.subr.bf16.mxu0 %v5580_v44  ;;  %2219 = vmatprep.subr.bf16.mxu1 %v5582_v45  ;;  %v5672_v43 = vld [vmem:[%s7837_s0 + $0xe0] ss:$28 sps:$4 sm:$0xff]   ;;  %v5676_v45 = vld [vmem:[%s7836_s1 + $0x308] ss:$16 sps:$4 sm:$0xff]  }
  0x2d   :  { %v5673_v44 = vld [vmem:[%s7836_s1 + $0x300] ss:$16 sps:$4 sm:$0xff]  }
  0x2f   :  { %1768 = vmatpush1.bf16.msra.mxu0 %v5584_v46  ;;  %2220 = vmatpush1.bf16.msra.mxu1 %v5585_v47  ;;  %v5681_v46 = vld [vmem:[%s7836_s1 + $0x324] ss:$16 sps:$4 sm:$0xff]   ;;  %v5684_v47 = vld [vmem:[%s7836_s1 + $0x32c] ss:$16 sps:$4 sm:$0xff]  }
  0x30   :  { %1769 = vmatprep.subr.bf16.mxu0 %v5586_v49  ;;  %2221 = vmatprep.subr.bf16.mxu1 %v5588_v50  ;;  %v5679_v49 = vld [vmem:[%s7836_s1 + $0x320] ss:$16 sps:$4 sm:$0xff]   ;;  %v5682_v50 = vld [vmem:[%s7836_s1 + $0x328] ss:$16 sps:$4 sm:$0xff]  }
  0x33   :  { %1770 = vmatpush1.bf16.msra.mxu0 %v5590_v51  ;;  %2222 = vmatpush1.bf16.msra.mxu1 %v5591_v52  ;;  %v5690_v51 = vld [vmem:[%s7836_s1 + $0x344] ss:$16 sps:$4 sm:$0xff]   ;;  %v5693_v52 = vld [vmem:[%s7836_s1 + $0x34c] ss:$16 sps:$4 sm:$0xff]  }
  0x34   :  { %1771 = vmatprep.subr.bf16.mxu0 %v5592_v53  ;;  %2223 = vmatprep.subr.bf16.mxu1 %v5594_v54  ;;  %v5687_v53 = vld [vmem:[%s7837_s0 + $0x118] ss:$28 sps:$4 sm:$0xff]   ;;  %v5688_v54 = vld [vmem:[%s7836_s1 + $0x340] ss:$16 sps:$4 sm:$0xff]  }
  0x37   :  { %1772 = vmatpush1.bf16.msra.mxu0 %v5596_v55  ;;  %2224 = vmatpush1.bf16.msra.mxu1 %v5597_v56  ;;  %v5691_v55 = vld [vmem:[%s7836_s1 + $0x348] ss:$16 sps:$4 sm:$0xff]   ;;  %v5696_v56 = vld [vmem:[%s7836_s1 + $0x364] ss:$16 sps:$4 sm:$0xff]  }
  0x38   :  { %1773 = vmatprep.subr.bf16.mxu0 %v5598_v57  ;;  %2225 = vmatprep.subr.bf16.mxu1 %v5600_v58  ;;  %v5699_v57 = vld [vmem:[%s7836_s1 + $0x36c] ss:$16 sps:$4 sm:$0xff]   ;;  %v5700_v58 = vld [vmem:[%s7837_s0 + $0x154] ss:$28 sps:$4 sm:$0xff]  }
  0x3b   :  { %1774 = vmatpush1.bf16.msra.mxu0 %v5602_v59  ;;  %2226 = vmatpush1.bf16.msra.mxu1 %v5603_v60  ;;  %v5694_v59 = vld [vmem:[%s7836_s1 + $0x360] ss:$16 sps:$4 sm:$0xff]   ;;  %v5697_v60 = vld [vmem:[%s7836_s1 + $0x368] ss:$16 sps:$4 sm:$0xff]  }
  0x3c   :  { %1775 = vmatprep.subr.bf16.mxu0 %v5604_v61  ;;  %2227 = vmatprep.subr.bf16.mxu1 %v5606_v62  ;;  %v5705_v61 = vld [vmem:[%s7836_s1 + $0x384] ss:$16 sps:$4 sm:$0xff]   ;;  %v5708_v62 = vld [vmem:[%s7836_s1 + $0x38c] ss:$16 sps:$4 sm:$0xff]  }
  0x3f   :  { %1776 = vmatpush1.bf16.msra.mxu0 %v5608_v63  ;;  %2228 = vmatpush1.bf16.msra.mxu1 %v5609_v0  ;;  %v5702_v63 = vld [vmem:[%s7837_s0 + $0x150] ss:$28 sps:$4 sm:$0xff]  }
  0x40   :  { %1858 = vmatprep.subr.bf16.mxu0 %v5615_v1  ;;  %2310 = vmatprep.subr.bf16.mxu1 %v5618_v2  ;;  %v5703_v0 = vld [vmem:[%s7836_s1 + $0x380] ss:$16 sps:$4 sm:$0xff]   ;;  %v5706_v1 = vld [vmem:[%s7836_s1 + $0x388] ss:$16 sps:$4 sm:$0xff]   ;;  %v5711_v2 = vld [vmem:[%s7836_s1 + $0x3a4] ss:$16 sps:$4 sm:$0xff]  }
  0x42   :  { %1778 = vmatmul.mubr.bf16.vlgmr.msra.gmra.mrb[0].mxu0 %v5610_v3  ;;  %2230 = vmatmul.mubr.bf16.vlgmr.msra.gmra.mrb[0].mxu1 %v5610_v3  ;;  %v5714_v3 = vld [vmem:[%s7836_s1 + $0x3ac] ss:$16 sps:$4 sm:$0xff]  }
  0x43   :  { %1859 = vmatpush1.bf16.msra.mxu0 %v5613_v4  ;;  %2311 = vmatpush1.bf16.msra.mxu1 %v5616_v5  ;;  %v5715_v4 = vld [vmem:[%s7837_s0 + $0x18c] ss:$28 sps:$4 sm:$0xff]   ;;  %v5709_v5 = vld [vmem:[%s7836_s1 + $0x3a0] ss:$16 sps:$4 sm:$0xff]  }
  0x44   :  { %1860 = vmatprep.subr.bf16.mxu0 %v5621_v6  ;;  %2312 = vmatprep.subr.bf16.mxu1 %v5624_v7  ;;  %v5712_v6 = vld [vmem:[%s7836_s1 + $0x3a8] ss:$16 sps:$4 sm:$0xff]   ;;  %v5720_v7 = vld [vmem:[%s7836_s1 + $0x3c4] ss:$16 sps:$4 sm:$0xff]  }
  0x45   :  { %1787 = vmatprep.mubr.bf16.mxu0 %v5625_v8  ;;  %2239 = vmatprep.mubr.bf16.mxu1 %v5625_v8  ;;  %v5723_v8 = vld [vmem:[%s7836_s1 + $0x3cc] ss:$16 sps:$4 sm:$0xff]  }
  0x47   :  { %1861 = vmatpush1.bf16.msra.mxu0 %v5619_v9  ;;  %2313 = vmatpush1.bf16.msra.mxu1 %v5622_v10  ;;  %v5717_v9 = vld [vmem:[%s7837_s0 + $0x188] ss:$28 sps:$4 sm:$0xff]   ;;  %v5718_v10 = vld [vmem:[%s7836_s1 + $0x3c0] ss:$16 sps:$4 sm:$0xff]  }
  0x48   :  { %1862 = vmatprep.subr.bf16.mxu0 %v5630_v11  ;;  %2314 = vmatprep.subr.bf16.mxu1 %v5633_v12  ;;  %v5721_v11 = vld [vmem:[%s7836_s1 + $0x3c8] ss:$16 sps:$4 sm:$0xff]   ;;  %v5726_v12 = vld [vmem:[%s7836_s1 + $0x3e4] ss:$16 sps:$4 sm:$0xff]  }
  0x4a   :  { %1788 = vmatmul.mubr.bf16.gmra.mrb[4].mxu0 %v5627_v13  ;;  %2240 = vmatmul.mubr.bf16.gmra.mrb[4].mxu1 %v5627_v13  ;;  %v5729_v13 = vld [vmem:[%s7836_s1 + $0x3ec] ss:$16 sps:$4 sm:$0xff]  }
  0x4b   :  { %1863 = vmatpush1.bf16.msra.mxu0 %v5628_v14  ;;  %2315 = vmatpush1.bf16.msra.mxu1 %v5631_v15  ;;  %v5732_v14 = vld [vmem:[%s7837_s0 + $0xc] ss:$28 sps:$4 sm:$0xff]   ;;  %v5724_v15 = vld [vmem:[%s7836_s1 + $0x3e0] ss:$16 sps:$4 sm:$0xff]  }
  0x4c   :  { %1864 = vmatprep.subr.bf16.mxu0 %v5636_v16  ;;  %2316 = vmatprep.subr.bf16.mxu1 %v5639_v17  ;;  %v5727_v16 = vld [vmem:[%s7836_s1 + $0x3e8] ss:$16 sps:$4 sm:$0xff]   ;;  %v5735_v17 = vld [vmem:[%s7836_s1 + $0x404] ss:$16 sps:$4 sm:$0xff]  }
  0x4d   :  { %1797 = vmatprep.mubr.bf16.mxu0 %v5640_v18  ;;  %2249 = vmatprep.mubr.bf16.mxu1 %v5640_v18  ;;  %v5738_v18 = vld [vmem:[%s7836_s1 + $0x40c] ss:$16 sps:$4 sm:$0xff]  }
  0x4f   :  { %1865 = vmatpush1.bf16.msra.mxu0 %v5634_v19  ;;  %2317 = vmatpush1.bf16.msra.mxu1 %v5637_v20  ;;  %v5730_v19 = vld [vmem:[%s7837_s0 + $0x8] ss:$28 sps:$4 sm:$0xff]   ;;  %v5733_v20 = vld [vmem:[%s7836_s1 + $0x400] ss:$16 sps:$4 sm:$0xff]  }
  0x50   :  { %1866 = vmatprep.subr.bf16.mxu0 %v5645_v21  ;;  %2318 = vmatprep.subr.bf16.mxu1 %v5648_v22  ;;  %v5736_v21 = vld [vmem:[%s7836_s1 + $0x408] ss:$16 sps:$4 sm:$0xff]   ;;  %v5741_v22 = vld [vmem:[%s7836_s1 + $0x424] ss:$16 sps:$4 sm:$0xff]  }
  0x52   :  { %1798 = vmatmul.mubr.bf16.gmra.mrb[8].mxu0 %v5642_v23  ;;  %2250 = vmatmul.mubr.bf16.gmra.mrb[8].mxu1 %v5642_v23  ;;  %v5744_v23 = vld [vmem:[%s7836_s1 + $0x42c] ss:$16 sps:$4 sm:$0xff]  }
  0x53   :  { %1867 = vmatpush1.bf16.msra.mxu0 %v5643_v24  ;;  %2319 = vmatpush1.bf16.msra.mxu1 %v5646_v25  ;;  %v5745_v24 = vld [vmem:[%s7837_s0 + $0x44] ss:$28 sps:$4 sm:$0xff]  }
  0x54   :  { %1868 = vmatprep.subr.bf16.mxu0 %v5651_v26  ;;  %2320 = vmatprep.subr.bf16.mxu1 %v5654_v27  ;;  %v5739_v25 = vld [vmem:[%s7836_s1 + $0x420] ss:$16 sps:$4 sm:$0xff]   ;;  %v5742_v26 = vld [vmem:[%s7836_s1 + $0x428] ss:$16 sps:$4 sm:$0xff]   ;;  %v5750_v27 = vld [vmem:[%s7836_s1 + $0x444] ss:$16 sps:$4 sm:$0xff]  }
  0x55   :  { %1807 = vmatprep.mubr.bf16.mxu0 %v5655_v28  ;;  %2259 = vmatprep.mubr.bf16.mxu1 %v5655_v28  ;;  %v5753_v28 = vld [vmem:[%s7836_s1 + $0x44c] ss:$16 sps:$4 sm:$0xff]  }
  0x57   :  { %1869 = vmatpush1.bf16.msra.mxu0 %v5649_v29  ;;  %2321 = vmatpush1.bf16.msra.mxu1 %v5652_v30  ;;  %v5747_v29 = vld [vmem:[%s7837_s0 + $0x40] ss:$28 sps:$4 sm:$0xff]  }
  0x58   :  { %1870 = vmatprep.subr.bf16.mxu0 %v5660_v31  ;;  %2322 = vmatprep.subr.bf16.mxu1 %v5663_v32  ;;  %v5748_v30 = vld [vmem:[%s7836_s1 + $0x440] ss:$16 sps:$4 sm:$0xff]   ;;  %v5751_v31 = vld [vmem:[%s7836_s1 + $0x448] ss:$16 sps:$4 sm:$0xff]   ;;  %v5756_v32 = vld [vmem:[%s7836_s1 + $0x464] ss:$16 sps:$4 sm:$0xff]  }
  0x5a   :  { %1808 = vmatmul.mubr.bf16.gmra.mrb[12].mxu0 %v5657_v33  ;;  %2260 = vmatmul.mubr.bf16.gmra.mrb[12].mxu1 %v5657_v33  ;;  %v5759_v33 = vld [vmem:[%s7836_s1 + $0x46c] ss:$16 sps:$4 sm:$0xff]  }
  0x5b   :  { %1871 = vmatpush1.bf16.msra.mxu0 %v5658_v34  ;;  %2323 = vmatpush1.bf16.msra.mxu1 %v5661_v35  ;;  %v5760_v34 = vld [vmem:[%s7837_s0 + $0x7c] ss:$28 sps:$4 sm:$0xff]   ;;  %v5754_v35 = vld [vmem:[%s7836_s1 + $0x460] ss:$16 sps:$4 sm:$0xff]  }
  0x5c   :  { %1872 = vmatprep.subr.bf16.mxu0 %v5666_v36  ;;  %2324 = vmatprep.subr.bf16.mxu1 %v5669_v37  ;;  %v5757_v36 = vld [vmem:[%s7836_s1 + $0x468] ss:$16 sps:$4 sm:$0xff]   ;;  %v5765_v37 = vld [vmem:[%s7836_s1 + $0x484] ss:$16 sps:$4 sm:$0xff]  }
  0x5d   :  { %1817 = vmatprep.mubr.bf16.mxu0 %v5670_v38  ;;  %2269 = vmatprep.mubr.bf16.mxu1 %v5670_v38  ;;  %v5768_v38 = vld [vmem:[%s7836_s1 + $0x48c] ss:$16 sps:$4 sm:$0xff]  }
  0x5f   :  { %1873 = vmatpush1.bf16.msra.mxu0 %v5664_v39  ;;  %2325 = vmatpush1.bf16.msra.mxu1 %v5667_v40  ;;  %v5762_v39 = vld [vmem:[%s7837_s0 + $0x78] ss:$28 sps:$4 sm:$0xff]   ;;  %v5763_v40 = vld [vmem:[%s7836_s1 + $0x480] ss:$16 sps:$4 sm:$0xff]  }
  0x60   :  { %1874 = vmatprep.subr.bf16.mxu0 %v5675_v41  ;;  %2326 = vmatprep.subr.bf16.mxu1 %v5678_v42  ;;  %v5766_v41 = vld [vmem:[%s7836_s1 + $0x488] ss:$16 sps:$4 sm:$0xff]   ;;  %v5771_v42 = vld [vmem:[%s7836_s1 + $0x4a4] ss:$16 sps:$4 sm:$0xff]  }
  0x62   :  { %1818 = vmatmul.mubr.bf16.gmra.mrb[16].mxu0 %v5672_v43  ;;  %2270 = vmatmul.mubr.bf16.gmra.mrb[16].mxu1 %v5672_v43  ;;  %v5774_v43 = vld [vmem:[%s7836_s1 + $0x4ac] ss:$16 sps:$4 sm:$0xff]  }
  0x63   :  { %1875 = vmatpush1.bf16.msra.mxu0 %v5673_v44  ;;  %2327 = vmatpush1.bf16.msra.mxu1 %v5676_v45  ;;  %v5775_v44 = vld [vmem:[%s7837_s0 + $0xb4] ss:$28 sps:$4 sm:$0xff]  }
  0x64   :  { %1876 = vmatprep.subr.bf16.mxu0 %v5681_v46  ;;  %2328 = vmatprep.subr.bf16.mxu1 %v5684_v47  ;;  %v5769_v45 = vld [vmem:[%s7836_s1 + $0x4a0] ss:$16 sps:$4 sm:$0xff]   ;;  %v5772_v46 = vld [vmem:[%s7836_s1 + $0x4a8] ss:$16 sps:$4 sm:$0xff]   ;;  %v5780_v47 = vld [vmem:[%s7836_s1 + $0x4c4] ss:$16 sps:$4 sm:$0xff]  }
  0x65   :  { %1827 = vmatprep.mubr.bf16.mxu0 %v5685_v48  ;;  %2279 = vmatprep.mubr.bf16.mxu1 %v5685_v48  ;;  %v5783_v48 = vld [vmem:[%s7836_s1 + $0x4cc] ss:$16 sps:$4 sm:$0xff]  }
  0x67   :  { %1877 = vmatpush1.bf16.msra.mxu0 %v5679_v49  ;;  %2329 = vmatpush1.bf16.msra.mxu1 %v5682_v50  ;;  %v5777_v49 = vld [vmem:[%s7837_s0 + $0xb0] ss:$28 sps:$4 sm:$0xff]  }
  0x68   :  { %1878 = vmatprep.subr.bf16.mxu0 %v5690_v51  ;;  %2330 = vmatprep.subr.bf16.mxu1 %v5693_v52  ;;  %v5778_v50 = vld [vmem:[%s7836_s1 + $0x4c0] ss:$16 sps:$4 sm:$0xff]   ;;  %v5781_v51 = vld [vmem:[%s7836_s1 + $0x4c8] ss:$16 sps:$4 sm:$0xff]   ;;  %v5786_v52 = vld [vmem:[%s7836_s1 + $0x4e4] ss:$16 sps:$4 sm:$0xff]  }
  0x6a   :  { %1828 = vmatmul.mubr.bf16.gmra.mrb[20].mxu0 %v5687_v53  ;;  %2280 = vmatmul.mubr.bf16.gmra.mrb[20].mxu1 %v5687_v53  ;;  %v5789_v53 = vld [vmem:[%s7836_s1 + $0x4ec] ss:$16 sps:$4 sm:$0xff]  }
  0x6b   :  { %1879 = vmatpush1.bf16.msra.mxu0 %v5688_v54  ;;  %2331 = vmatpush1.bf16.msra.mxu1 %v5691_v55  ;;  %v5790_v54 = vld [vmem:[%s7837_s0 + $0xec] ss:$28 sps:$4 sm:$0xff]   ;;  %v5784_v55 = vld [vmem:[%s7836_s1 + $0x4e0] ss:$16 sps:$4 sm:$0xff]  }
  0x6c   :  { %1880 = vmatprep.subr.bf16.mxu0 %v5696_v56  ;;  %2332 = vmatprep.subr.bf16.mxu1 %v5699_v57  ;;  %v5787_v56 = vld [vmem:[%s7836_s1 + $0x4e8] ss:$16 sps:$4 sm:$0xff]   ;;  %v5795_v57 = vld [vmem:[%s7836_s1 + $0x504] ss:$16 sps:$4 sm:$0xff]  }
  0x6d   :  { %1837 = vmatprep.mubr.bf16.mxu0 %v5700_v58  ;;  %2289 = vmatprep.mubr.bf16.mxu1 %v5700_v58  ;;  %v5798_v58 = vld [vmem:[%s7836_s1 + $0x50c] ss:$16 sps:$4 sm:$0xff]  }
  0x6f   :  { %1881 = vmatpush1.bf16.msra.mxu0 %v5694_v59  ;;  %2333 = vmatpush1.bf16.msra.mxu1 %v5697_v60  ;;  %v5792_v59 = vld [vmem:[%s7837_s0 + $0xe8] ss:$28 sps:$4 sm:$0xff]   ;;  %v5793_v60 = vld [vmem:[%s7836_s1 + $0x500] ss:$16 sps:$4 sm:$0xff]  }
  0x70   :  { %1882 = vmatprep.subr.bf16.mxu0 %v5705_v61  ;;  %2334 = vmatprep.subr.bf16.mxu1 %v5708_v62  ;;  %v5796_v61 = vld [vmem:[%s7836_s1 + $0x508] ss:$16 sps:$4 sm:$0xff]   ;;  %v5801_v62 = vld [vmem:[%s7836_s1 + $0x524] ss:$16 sps:$4 sm:$0xff]  }
  0x72   :  { %1838 = vmatmul.mubr.bf16.gmra.mrb[24].mxu0 %v5702_v63  ;;  %2290 = vmatmul.mubr.bf16.gmra.mrb[24].mxu1 %v5702_v63  ;;  %v5804_v63 = vld [vmem:[%s7836_s1 + $0x52c] ss:$16 sps:$4 sm:$0xff]  }
  0x73   :  { %1883 = vmatpush1.bf16.msra.mxu0 %v5703_v0  ;;  %2335 = vmatpush1.bf16.msra.mxu1 %v5706_v1  ;;  %v5805_v0 = vld [vmem:[%s7837_s0 + $0x124] ss:$28 sps:$4 sm:$0xff]  }
  0x74   :  { %1884 = vmatprep.subr.bf16.mxu0 %v5711_v2  ;;  %2336 = vmatprep.subr.bf16.mxu1 %v5714_v3  ;;  %v5799_v1 = vld [vmem:[%s7836_s1 + $0x520] ss:$16 sps:$4 sm:$0xff]   ;;  %v5802_v2 = vld [vmem:[%s7836_s1 + $0x528] ss:$16 sps:$4 sm:$0xff]   ;;  %v5810_v3 = vld [vmem:[%s7836_s1 + $0x544] ss:$16 sps:$4 sm:$0xff]  }
  0x75   :  { %1847 = vmatprep.mubr.bf16.mxu0 %v5715_v4  ;;  %2299 = vmatprep.mubr.bf16.mxu1 %v5715_v4  ;;  %v5813_v4 = vld [vmem:[%s7836_s1 + $0x54c] ss:$16 sps:$4 sm:$0xff]  }
  0x77   :  { %1885 = vmatpush1.bf16.msra.mxu0 %v5709_v5  ;;  %2337 = vmatpush1.bf16.msra.mxu1 %v5712_v6  ;;  %v5807_v5 = vld [vmem:[%s7837_s0 + $0x120] ss:$28 sps:$4 sm:$0xff]  }
  0x78   :  { %1886 = vmatprep.subr.bf16.mxu0 %v5720_v7  ;;  %2338 = vmatprep.subr.bf16.mxu1 %v5723_v8  ;;  %v5808_v6 = vld [vmem:[%s7836_s1 + $0x540] ss:$16 sps:$4 sm:$0xff]   ;;  %v5811_v7 = vld [vmem:[%s7836_s1 + $0x548] ss:$16 sps:$4 sm:$0xff]   ;;  %v5816_v8 = vld [vmem:[%s7836_s1 + $0x564] ss:$16 sps:$4 sm:$0xff]  }
  0x7a   :  { %1848 = vmatmul.mubr.bf16.gmra.mrb[28].mxu0 %v5717_v9  ;;  %2300 = vmatmul.mubr.bf16.gmra.mrb[28].mxu1 %v5717_v9  ;;  %v5819_v9 = vld [vmem:[%s7836_s1 + $0x56c] ss:$16 sps:$4 sm:$0xff]  }
  0x7b   :  { %1887 = vmatpush1.bf16.msra.mxu0 %v5718_v10  ;;  %2339 = vmatpush1.bf16.msra.mxu1 %v5721_v11  ;;  %v5820_v10 = vld [vmem:[%s7837_s0 + $0x15c] ss:$28 sps:$4 sm:$0xff]   ;;  %v5814_v11 = vld [vmem:[%s7836_s1 + $0x560] ss:$16 sps:$4 sm:$0xff]  }
  0x7c   :  { %1888 = vmatprep.subr.bf16.mxu0 %v5726_v12  ;;  %2340 = vmatprep.subr.bf16.mxu1 %v5729_v13  ;;  %v5817_v12 = vld [vmem:[%s7836_s1 + $0x568] ss:$16 sps:$4 sm:$0xff]   ;;  %v5825_v13 = vld [vmem:[%s7836_s1 + $0x584] ss:$16 sps:$4 sm:$0xff]  }
  0x7d   :  { %1890 = vmatprep.mubr.bf16.mxu0 %v5732_v14  ;;  %2342 = vmatprep.mubr.bf16.mxu1 %v5732_v14  ;;  %v5828_v14 = vld [vmem:[%s7836_s1 + $0x58c] ss:$16 sps:$4 sm:$0xff]  }
  0x7f   :  { %1889 = vmatpush1.bf16.msra.mxu0 %v5724_v15  ;;  %2341 = vmatpush1.bf16.msra.mxu1 %v5727_v16  ;;  %v5822_v15 = vld [vmem:[%s7837_s0 + $0x158] ss:$28 sps:$4 sm:$0xff]   ;;  %v5823_v16 = vld [vmem:[%s7836_s1 + $0x580] ss:$16 sps:$4 sm:$0xff]  }
  0x80   :  { %1971 = vmatprep.subr.bf16.mxu0 %v5735_v17  ;;  %2423 = vmatprep.subr.bf16.mxu1 %v5738_v18  ;;  %v5826_v17 = vld [vmem:[%s7836_s1 + $0x588] ss:$16 sps:$4 sm:$0xff]   ;;  %v5831_v18 = vld [vmem:[%s7836_s1 + $0x5a4] ss:$16 sps:$4 sm:$0xff]  }
  0x82   :  { %1891 = vmatmul.mubr.bf16.vlgmr.msra.gmra.mrb[0].mxu0 %v5730_v19  ;;  %2343 = vmatmul.mubr.bf16.vlgmr.msra.gmra.mrb[0].mxu1 %v5730_v19  ;;  %v5834_v19 = vld [vmem:[%s7836_s1 + $0x5ac] ss:$16 sps:$4 sm:$0xff]  }
  0x83   :  { %1972 = vmatpush1.bf16.msra.mxu0 %v5733_v20  ;;  %2424 = vmatpush1.bf16.msra.mxu1 %v5736_v21  ;;  %v5835_v20 = vld [vmem:[%s7837_s0 + $0x194] ss:$28 sps:$4 sm:$0xff]  }
  0x84   :  { %1973 = vmatprep.subr.bf16.mxu0 %v5741_v22  ;;  %2425 = vmatprep.subr.bf16.mxu1 %v5744_v23  ;;  %v5829_v21 = vld [vmem:[%s7836_s1 + $0x5a0] ss:$16 sps:$4 sm:$0xff]   ;;  %v5832_v22 = vld [vmem:[%s7836_s1 + $0x5a8] ss:$16 sps:$4 sm:$0xff]   ;;  %v5840_v23 = vld [vmem:[%s7836_s1 + $0x5c4] ss:$16 sps:$4 sm:$0xff]  }
  0x85   :  { %1900 = vmatprep.mubr.bf16.mxu0 %v5745_v24  ;;  %2352 = vmatprep.mubr.bf16.mxu1 %v5745_v24  ;;  %v5837_v24 = vld [vmem:[%s7837_s0 + $0x190] ss:$28 sps:$4 sm:$0xff]  }
  0x87   :  { %1974 = vmatpush1.bf16.msra.mxu0 %v5739_v25  ;;  %2426 = vmatpush1.bf16.msra.mxu1 %v5742_v26  ;;  %v5843_v25 = vld [vmem:[%s7836_s1 + $0x5cc] ss:$16 sps:$4 sm:$0xff]   ;;  %v5838_v26 = vld [vmem:[%s7836_s1 + $0x5c0] ss:$16 sps:$4 sm:$0xff]  }
  0x88   :  { %1975 = vmatprep.subr.bf16.mxu0 %v5750_v27  ;;  %2427 = vmatprep.subr.bf16.mxu1 %v5753_v28  ;;  %v5841_v27 = vld [vmem:[%s7836_s1 + $0x5c8] ss:$16 sps:$4 sm:$0xff]   ;;  %v5846_v28 = vld [vmem:[%s7836_s1 + $0x5e4] ss:$16 sps:$4 sm:$0xff]  }
  0x8a   :  { %1901 = vmatmul.mubr.bf16.gmra.mrb[4].mxu0 %v5747_v29  ;;  %2353 = vmatmul.mubr.bf16.gmra.mrb[4].mxu1 %v5747_v29  ;;  %v5849_v29 = vld [vmem:[%s7836_s1 + $0x5ec] ss:$16 sps:$4 sm:$0xff]  }
  0x8b   :  { %1976 = vmatpush1.bf16.msra.mxu0 %v5748_v30  ;;  %2428 = vmatpush1.bf16.msra.mxu1 %v5751_v31  ;;  %v5844_v30 = vld [vmem:[%s7836_s1 + $0x5e0] ss:$16 sps:$4 sm:$0xff]  }
  0x8c   :  { %1977 = vmatprep.subr.bf16.mxu0 %v5756_v32  ;;  %2429 = vmatprep.subr.bf16.mxu1 %v5759_v33  ;;  %v5852_v31 = vld [vmem:[%s7837_s0 + $0x14] ss:$28 sps:$4 sm:$0xff]   ;;  %v5847_v32 = vld [vmem:[%s7836_s1 + $0x5e8] ss:$16 sps:$4 sm:$0xff]  }
  0x8d   :  { %1910 = vmatprep.mubr.bf16.mxu0 %v5760_v34  ;;  %2362 = vmatprep.mubr.bf16.mxu1 %v5760_v34  ;;  %v5855_v33 = vld [vmem:[%s7836_s1 + $0x604] ss:$16 sps:$4 sm:$0xff]   ;;  %v5882_v34 = vld [vmem:[%s7836_s1 + $0x60c] ss:$16 sps:$4 sm:$0xff]  }
  0x8f   :  { %1978 = vmatpush1.bf16.msra.mxu0 %v5754_v35  ;;  %2430 = vmatpush1.bf16.msra.mxu1 %v5757_v36  ;;  %v5850_v35 = vld [vmem:[%s7837_s0 + $0x10] ss:$28 sps:$4 sm:$0xff]  }
  0x90   :  { %1979 = vmatprep.subr.bf16.mxu0 %v5765_v37  ;;  %2431 = vmatprep.subr.bf16.mxu1 %v5768_v38  ;;  %v5853_v36 = vld [vmem:[%s7836_s1 + $0x600] ss:$16 sps:$4 sm:$0xff]   ;;  %v5856_v37 = vld [vmem:[%s7837_s0 + $0x4c] ss:$28 sps:$4 sm:$0xff]   ;;  %v5861_v38 = vld [vmem:[%s7836_s1 + $0x624] ss:$16 sps:$4 sm:$0xff]  }
  0x92   :  { %1911 = vmatmul.mubr.bf16.gmra.mrb[8].mxu0 %v5762_v39  ;;  %2363 = vmatmul.mubr.bf16.gmra.mrb[8].mxu1 %v5762_v39  ;;  %v5880_v39 = vld [vmem:[%s7836_s1 + $0x608] ss:$16 sps:$4 sm:$0xff]  }
  0x93   :  { %1980 = vmatpush1.bf16.msra.mxu0 %v5763_v40  ;;  %2432 = vmatpush1.bf16.msra.mxu1 %v5766_v41  ;;  %v5885_v40 = vld [vmem:[%s7836_s1 + $0x62c] ss:$16 sps:$4 sm:$0xff]   ;;  %v5859_v41 = vld [vmem:[%s7836_s1 + $0x620] ss:$16 sps:$4 sm:$0xff]  }
  0x94   :  { %1981 = vmatprep.subr.bf16.mxu0 %v5771_v42  ;;  %2433 = vmatprep.subr.bf16.mxu1 %v5774_v43  ;;  %v5867_v42 = vld [vmem:[%s7836_s1 + $0x644] ss:$16 sps:$4 sm:$0xff]   ;;  %v5883_v43 = vld [vmem:[%s7836_s1 + $0x628] ss:$16 sps:$4 sm:$0xff]  }
  0x95   :  { %1920 = vmatprep.mubr.bf16.mxu0 %v5775_v44  ;;  %2372 = vmatprep.mubr.bf16.mxu1 %v5775_v44  ;;  %v5858_v44 = vld [vmem:[%s7837_s0 + $0x48] ss:$28 sps:$4 sm:$0xff]  }
  0x97   :  { %1982 = vmatpush1.bf16.msra.mxu0 %v5769_v45  ;;  %2434 = vmatpush1.bf16.msra.mxu1 %v5772_v46  ;;  %v5862_v45 = vld [vmem:[%s7837_s0 + $0x84] ss:$28 sps:$4 sm:$0xff]  }
  0x98   :  { %1983 = vmatprep.subr.bf16.mxu0 %v5780_v47  ;;  %2435 = vmatprep.subr.bf16.mxu1 %v5783_v48  ;;  %v5865_v46 = vld [vmem:[%s7836_s1 + $0x640] ss:$16 sps:$4 sm:$0xff]   ;;  %v5894_v47 = vld [vmem:[%s7836_s1 + $0x64c] ss:$16 sps:$4 sm:$0xff]   ;;  %v5873_v48 = vld [vmem:[%s7836_s1 + $0x664] ss:$16 sps:$4 sm:$0xff]  }
  0x9a   :  { %1921 = vmatmul.mubr.bf16.gmra.mrb[12].mxu0 %v5777_v49  ;;  %2373 = vmatmul.mubr.bf16.gmra.mrb[12].mxu1 %v5777_v49  ;;  %v5892_v49 = vld [vmem:[%s7836_s1 + $0x648] ss:$16 sps:$4 sm:$0xff]  }
  0x9b   :  { %1984 = vmatpush1.bf16.msra.mxu0 %v5778_v50  ;;  %2436 = vmatpush1.bf16.msra.mxu1 %v5781_v51  ;;  %v5897_v50 = vld [vmem:[%s7836_s1 + $0x66c] ss:$16 sps:$4 sm:$0xff]   ;;  %v5871_v51 = vld [vmem:[%s7836_s1 + $0x660] ss:$16 sps:$4 sm:$0xff]  }
  0x9c   :  { %1985 = vmatprep.subr.bf16.mxu0 %v5786_v52  ;;  %2437 = vmatprep.subr.bf16.mxu1 %v5789_v53  ;;  %v5879_v52 = vld [vmem:[%s7836_s1 + $0x684] ss:$16 sps:$4 sm:$0xff]   ;;  %v5895_v53 = vld [vmem:[%s7836_s1 + $0x668] ss:$16 sps:$4 sm:$0xff]  }
  0x9d   :  { %1930 = vmatprep.mubr.bf16.mxu0 %v5790_v54  ;;  %2382 = vmatprep.mubr.bf16.mxu1 %v5790_v54  ;;  %v5864_v54 = vld [vmem:[%s7837_s0 + $0x80] ss:$28 sps:$4 sm:$0xff]  }
  0x9f   :  { %1986 = vmatpush1.bf16.msra.mxu0 %v5784_v55  ;;  %2438 = vmatpush1.bf16.msra.mxu1 %v5787_v56  ;;  %v5868_v55 = vld [vmem:[%s7837_s0 + $0xbc] ss:$28 sps:$4 sm:$0xff]   ;;  %v5877_v56 = vld [vmem:[%s7836_s1 + $0x680] ss:$16 sps:$4 sm:$0xff]  }
  0xa0   :  { %1987 = vmatprep.subr.bf16.mxu0 %v5795_v57  ;;  %2439 = vmatprep.subr.bf16.mxu1 %v5798_v58  ;;  %v5906_v57 = vld [vmem:[%s7836_s1 + $0x68c] ss:$16 sps:$4 sm:$0xff]   ;;  %v5891_v58 = vld [vmem:[%s7836_s1 + $0x6a4] ss:$16 sps:$4 sm:$0xff]  }
  0xa2   :  { %1931 = vmatmul.mubr.bf16.gmra.mrb[16].mxu0 %v5792_v59  ;;  %2383 = vmatmul.mubr.bf16.gmra.mrb[16].mxu1 %v5792_v59  ;;  %v5904_v59 = vld [vmem:[%s7836_s1 + $0x688] ss:$16 sps:$4 sm:$0xff]  }
  0xa3   :  { %1988 = vmatpush1.bf16.msra.mxu0 %v5793_v60  ;;  %2440 = vmatpush1.bf16.msra.mxu1 %v5796_v61  ;;  %v5909_v60 = vld [vmem:[%s7836_s1 + $0x6ac] ss:$16 sps:$4 sm:$0xff]   ;;  %v5889_v61 = vld [vmem:[%s7836_s1 + $0x6a0] ss:$16 sps:$4 sm:$0xff]  }
  0xa4   :  { %1989 = vmatprep.subr.bf16.mxu0 %v5801_v62  ;;  %2441 = vmatprep.subr.bf16.mxu1 %v5804_v63  ;;  %v5903_v62 = vld [vmem:[%s7836_s1 + $0x6c4] ss:$16 sps:$4 sm:$0xff]   ;;  %v5907_v63 = vld [vmem:[%s7836_s1 + $0x6a8] ss:$16 sps:$4 sm:$0xff]  }
  0xa5   :  { %1940 = vmatprep.mubr.bf16.mxu0 %v5805_v0  ;;  %2392 = vmatprep.mubr.bf16.mxu1 %v5805_v0  ;;  %v5870_v0 = vld [vmem:[%s7837_s0 + $0xb8] ss:$28 sps:$4 sm:$0xff]  }
  0xa7   :  { %1990 = vmatpush1.bf16.msra.mxu0 %v5799_v1  ;;  %2442 = vmatpush1.bf16.msra.mxu1 %v5802_v2  ;;  %v5874_v1 = vld [vmem:[%s7837_s0 + $0xf4] ss:$28 sps:$4 sm:$0xff]  }
  0xa8   :  { %1991 = vmatprep.subr.bf16.mxu0 %v5810_v3  ;;  %2443 = vmatprep.subr.bf16.mxu1 %v5813_v4  ;;  %v5901_v2 = vld [vmem:[%s7836_s1 + $0x6c0] ss:$16 sps:$4 sm:$0xff]   ;;  %v5918_v3 = vld [vmem:[%s7836_s1 + $0x6cc] ss:$16 sps:$4 sm:$0xff]   ;;  %v5915_v4 = vld [vmem:[%s7836_s1 + $0x6e4] ss:$16 sps:$4 sm:$0xff]  }
  0xaa   :  { %1941 = vmatmul.mubr.bf16.gmra.mrb[20].mxu0 %v5807_v5  ;;  %2393 = vmatmul.mubr.bf16.gmra.mrb[20].mxu1 %v5807_v5  ;;  %v5916_v5 = vld [vmem:[%s7836_s1 + $0x6c8] ss:$16 sps:$4 sm:$0xff]  }
  0xab   :  { %1992 = vmatpush1.bf16.msra.mxu0 %v5808_v6  ;;  %2444 = vmatpush1.bf16.msra.mxu1 %v5811_v7  ;;  %v5921_v6 = vld [vmem:[%s7836_s1 + $0x6ec] ss:$16 sps:$4 sm:$0xff]   ;;  %v5913_v7 = vld [vmem:[%s7836_s1 + $0x6e0] ss:$16 sps:$4 sm:$0xff]  }
  0xac   :  { %1993 = vmatprep.subr.bf16.mxu0 %v5816_v8  ;;  %2445 = vmatprep.subr.bf16.mxu1 %v5819_v9  ;;  %v5919_v8 = vld [vmem:[%s7836_s1 + $0x6e8] ss:$16 sps:$4 sm:$0xff]   ;;  %v5932_v9 = vld [vmem:[%s7838_s3 + $0x4] ss:$16 sps:$4 sm:$0xff]  }
  0xad   :  { %1950 = vmatprep.mubr.bf16.mxu0 %v5820_v10  ;;  %2402 = vmatprep.mubr.bf16.mxu1 %v5820_v10  ;;  %v5876_v10 = vld [vmem:[%s7837_s0 + $0xf0] ss:$28 sps:$4 sm:$0xff]  }
  0xaf   :  { %1994 = vmatpush1.bf16.msra.mxu0 %v5814_v11  ;;  %2446 = vmatpush1.bf16.msra.mxu1 %v5817_v12  ;;  %v5886_v11 = vld [vmem:[%s7837_s0 + $0x12c] ss:$28 sps:$4 sm:$0xff]  }
  0xb0   :  { %1995 = vmatprep.subr.bf16.mxu0 %v5825_v13  ;;  %2447 = vmatprep.subr.bf16.mxu1 %v5828_v14  ;;  %v5935_v12 = vld [vmem:[%s7838_s3 + $0xc] ss:$16 sps:$4 sm:$0xff]   ;;  %v5888_v13 = vld [vmem:[%s7837_s0 + $0x128] ss:$28 sps:$4 sm:$0xff]  }
  0xb1   :  { %v5898_v14 = vld [vmem:[%s7837_s0 + $0x164] ss:$28 sps:$4 sm:$0xff]  }
  0xb2   :  { %1951 = vmatmul.mubr.bf16.gmra.mrb[24].mxu0 %v5822_v15  ;;  %2403 = vmatmul.mubr.bf16.gmra.mrb[24].mxu1 %v5822_v15  ;;  %v5900_v15 = vld [vmem:[%s7837_s0 + $0x160] ss:$28 sps:$4 sm:$0xff]  }
  0xb3   :  { %1996 = vmatpush1.bf16.msra.mxu0 %v5823_v16  ;;  %2448 = vmatpush1.bf16.msra.mxu1 %v5826_v17  ;;  %v5910_v16 = vld [vmem:[%s7837_s0 + $0x19c] ss:$28 sps:$4 sm:$0xff]  }
  0xb4   :  { %1997 = vmatprep.subr.bf16.mxu0 %v5831_v18  ;;  %2449 = vmatprep.subr.bf16.mxu1 %v5834_v19  ;;  %v5912_v17 = vld [vmem:[%s7837_s0 + $0x198] ss:$28 sps:$4 sm:$0xff]   ;;  %v6154_v18 = vmov 0  }
  0xb5   :  { %1960 = vmatprep.mubr.bf16.mxu0 %v5835_v20  ;;  %2412 = vmatprep.mubr.bf16.mxu1 %v5835_v20  ;;  %v5922_v19 = vld [vmem:[%s7837_s0 + $0x18] ss:$28 sps:$4 sm:$0xff]   ;;  %v5930_v20 = vld [vmem:[%s7838_s3] ss:$16 sps:$4 sm:$0xff]  }
  0xb7   :  { %1998 = vmatpush1.bf16.msra.mxu0 %v5829_v21  ;;  %2450 = vmatpush1.bf16.msra.mxu1 %v5832_v22  ;;  %v5933_v21 = vld [vmem:[%s7838_s3 + $0x8] ss:$16 sps:$4 sm:$0xff]   ;;  %v5938_v22 = vld [vmem:[%s7838_s3 + $0x24] ss:$16 sps:$4 sm:$0xff]  }
  0xb8   :  { %1999 = vmatprep.subr.bf16.mxu0 %v5840_v23  ;;  %2451 = vmatprep.subr.bf16.mxu1 %v5843_v25  ;;  %v5941_v23 = vld [vmem:[%s7838_s3 + $0x2c] ss:$16 sps:$4 sm:$0xff]   ;;  %v5939_v25 = vld [vmem:[%s7838_s3 + $0x28] ss:$16 sps:$4 sm:$0xff]  }
  0xba   :  { %1961 = vmatmul.mubr.bf16.gmra.mrb[28].mxu0 %v5837_v24  ;;  %2413 = vmatmul.mubr.bf16.gmra.mrb[28].mxu1 %v5837_v24  ;;  %v5936_v24 = vld [vmem:[%s7838_s3 + $0x20] ss:$16 sps:$4 sm:$0xff]  }
  0xbb   :  { %2000 = vmatpush1.bf16.msra.mxu0 %v5838_v26  ;;  %2452 = vmatpush1.bf16.msra.mxu1 %v5841_v27  ;;  %v5944_v26 = vld [vmem:[%s7838_s3 + $0x44] ss:$16 sps:$4 sm:$0xff]   ;;  %v5947_v27 = vld [vmem:[%s7838_s3 + $0x4c] ss:$16 sps:$4 sm:$0xff]  }
  0xbc   :  { %2001 = vmatprep.subr.bf16.mxu0 %v5846_v28  ;;  %2453 = vmatprep.subr.bf16.mxu1 %v5849_v29  ;;  %v5923_v28 = vld [vmem:[%s7837_s0 + $0x50] ss:$28 sps:$4 sm:$0xff]  }
  0xbd   :  { %2003 = vmatprep.mubr.bf16.mxu0 %v5852_v31  ;;  %2455 = vmatprep.mubr.bf16.mxu1 %v5852_v31  ;;  %v5942_v29 = vld [vmem:[%s7838_s3 + $0x40] ss:$16 sps:$4 sm:$0xff]   ;;  %v5950_v31 = vld [vmem:[%s7838_s3 + $0x64] ss:$16 sps:$4 sm:$0xff]  }
  0xbf   :  { %2002 = vmatpush1.bf16.msra.mxu0 %v5844_v30  ;;  %2454 = vmatpush1.bf16.msra.mxu1 %v5847_v32  ;;  %v5945_v30 = vld [vmem:[%s7838_s3 + $0x48] ss:$16 sps:$4 sm:$0xff]   ;;  %v5953_v32 = vld [vmem:[%s7838_s3 + $0x6c] ss:$16 sps:$4 sm:$0xff]  }
  0xc0   :  { %2084 = vmatprep.subr.bf16.mxu0 %v5855_v33  ;;  %2536 = vmatprep.subr.bf16.mxu1 %v5882_v34  ;;  %v5948_v33 = vld [vmem:[%s7838_s3 + $0x60] ss:$16 sps:$4 sm:$0xff]   ;;  %v5951_v34 = vld [vmem:[%s7838_s3 + $0x68] ss:$16 sps:$4 sm:$0xff]  }
  0xc2   :  { %2004 = vmatmul.mubr.bf16.vlgmr.msra.gmra.mrb[0].mxu0 %v5850_v35  ;;  %2456 = vmatmul.mubr.bf16.vlgmr.msra.gmra.mrb[0].mxu1 %v5850_v35  ;;  %v5956_v35 = vld [vmem:[%s7838_s3 + $0x84] ss:$16 sps:$4 sm:$0xff]  }
  0xc3   :  { %2085 = vmatpush1.bf16.msra.mxu0 %v5853_v36  ;;  %2013 = vmatprep.mubr.bf16.mxu0 %v5856_v37  ;;  %v5959_v36 = vld [vmem:[%s7838_s3 + $0x8c] ss:$16 sps:$4 sm:$0xff]  }
  0xc4   :  { %2465 = vmatprep.mubr.bf16.mxu1 %v5856_v37  ;;  %2086 = vmatprep.subr.bf16.mxu0 %v5861_v38  ;;  %v5924_v37 = vld [vmem:[%s7837_s0 + $0x88] ss:$28 sps:$4 sm:$0xff]   ;;  %v5954_v38 = vld [vmem:[%s7838_s3 + $0x80] ss:$16 sps:$4 sm:$0xff]  }
  0xc5   :  { %2537 = vmatpush1.bf16.msra.mxu1 %v5880_v39  ;;  %v5957_v39 = vld [vmem:[%s7838_s3 + $0x88] ss:$16 sps:$4 sm:$0xff]  }
  0xc6   :  { %2538 = vmatprep.subr.bf16.mxu1 %v5885_v40  ;;  %v5962_v40 = vld [vmem:[%s7838_s3 + $0xa4] ss:$16 sps:$4 sm:$0xff]  }
  0xc7   :  { %2087 = vmatpush1.bf16.msra.mxu0 %v5859_v41  ;;  %v5965_v41 = vld [vmem:[%s7838_s3 + $0xac] ss:$16 sps:$4 sm:$0xff]  }
  0xc8   :  { %2088 = vmatprep.subr.bf16.mxu0 %v5867_v42  ;;  %v5960_v42 = vld [vmem:[%s7838_s3 + $0xa0] ss:$16 sps:$4 sm:$0xff]  }
  0xc9   :  { %2539 = vmatpush1.bf16.msra.mxu1 %v5883_v43  ;;  %v5963_v43 = vld [vmem:[%s7838_s3 + $0xa8] ss:$16 sps:$4 sm:$0xff]  }
  0xca   :  { %2014 = vmatmul.mubr.bf16.gmra.mrb[4].mxu0 %v5858_v44  ;;  %2466 = vmatmul.mubr.bf16.gmra.mrb[4].mxu1 %v5858_v44  ;;  %v5968_v44 = vld [vmem:[%s7838_s3 + $0xc4] ss:$16 sps:$4 sm:$0xff]  }
  0xcb   :  { %2023 = vmatprep.mubr.bf16.mxu0 %v5862_v45  ;;  %2475 = vmatprep.mubr.bf16.mxu1 %v5862_v45  ;;  %v5971_v45 = vld [vmem:[%s7838_s3 + $0xcc] ss:$16 sps:$4 sm:$0xff]  }
  0xcc   :  { %2089 = vmatpush1.bf16.msra.mxu0 %v5865_v46  ;;  %2540 = vmatprep.subr.bf16.mxu1 %v5894_v47  ;;  %v5925_v46 = vld [vmem:[%s7837_s0 + $0xc0] ss:$28 sps:$4 sm:$0xff]  }
  0xcd   :  { %2090 = vmatprep.subr.bf16.mxu0 %v5873_v48  ;;  %2541 = vmatpush1.bf16.msra.mxu1 %v5892_v49  ;;  %v5966_v47 = vld [vmem:[%s7838_s3 + $0xc0] ss:$16 sps:$4 sm:$0xff]   ;;  %v5969_v48 = vld [vmem:[%s7838_s3 + $0xc8] ss:$16 sps:$4 sm:$0xff]   ;;  %v5974_v49 = vld [vmem:[%s7838_s3 + $0xe4] ss:$16 sps:$4 sm:$0xff]  }
  0xce   :  { %2542 = vmatprep.subr.bf16.mxu1 %v5897_v50  ;;  %v5977_v50 = vld [vmem:[%s7838_s3 + $0xec] ss:$16 sps:$4 sm:$0xff]  }
  0xd0   :  { %2091 = vmatpush1.bf16.msra.mxu0 %v5871_v51  ;;  %v5972_v51 = vld [vmem:[%s7838_s3 + $0xe0] ss:$16 sps:$4 sm:$0xff]  }
  0xd1   :  { %2092 = vmatprep.subr.bf16.mxu0 %v5879_v52  ;;  %2543 = vmatpush1.bf16.msra.mxu1 %v5895_v53  ;;  %v5975_v52 = vld [vmem:[%s7838_s3 + $0xe8] ss:$16 sps:$4 sm:$0xff]   ;;  %v5980_v53 = vld [vmem:[%s7838_s3 + $0x104] ss:$16 sps:$4 sm:$0xff]  }
  0xd2   :  { %2024 = vmatmul.mubr.bf16.gmra.mrb[8].mxu0 %v5864_v54  ;;  %2476 = vmatmul.mubr.bf16.gmra.mrb[8].mxu1 %v5864_v54  ;;  %v5983_v54 = vld [vmem:[%s7838_s3 + $0x10c] ss:$16 sps:$4 sm:$0xff]  }
  0xd3   :  { %2033 = vmatprep.mubr.bf16.mxu0 %v5868_v55  ;;  %2485 = vmatprep.mubr.bf16.mxu1 %v5868_v55  ;;  %v5926_v55 = vld [vmem:[%s7837_s0 + $0xf8] ss:$28 sps:$4 sm:$0xff]  }
  0xd4   :  { %2093 = vmatpush1.bf16.msra.mxu0 %v5877_v56  ;;  %2544 = vmatprep.subr.bf16.mxu1 %v5906_v57  ;;  %v5978_v56 = vld [vmem:[%s7838_s3 + $0x100] ss:$16 sps:$4 sm:$0xff]   ;;  %v5981_v57 = vld [vmem:[%s7838_s3 + $0x108] ss:$16 sps:$4 sm:$0xff]  }
  0xd5   :  { %2094 = vmatprep.subr.bf16.mxu0 %v5891_v58  ;;  %2545 = vmatpush1.bf16.msra.mxu1 %v5904_v59  ;;  %v5986_v58 = vld [vmem:[%s7838_s3 + $0x124] ss:$16 sps:$4 sm:$0xff]   ;;  %v5989_v59 = vld [vmem:[%s7838_s3 + $0x12c] ss:$16 sps:$4 sm:$0xff]  }
  0xd6   :  { %2546 = vmatprep.subr.bf16.mxu1 %v5909_v60  ;;  %v5984_v60 = vld [vmem:[%s7838_s3 + $0x120] ss:$16 sps:$4 sm:$0xff]  }
  0xd8   :  { %2095 = vmatpush1.bf16.msra.mxu0 %v5889_v61  ;;  %v5987_v61 = vld [vmem:[%s7838_s3 + $0x128] ss:$16 sps:$4 sm:$0xff]  }
  0xd9   :  { %2096 = vmatprep.subr.bf16.mxu0 %v5903_v62  ;;  %2547 = vmatpush1.bf16.msra.mxu1 %v5907_v63  ;;  %v5992_v62 = vld [vmem:[%s7838_s3 + $0x144] ss:$16 sps:$4 sm:$0xff]   ;;  %v5995_v63 = vld [vmem:[%s7838_s3 + $0x14c] ss:$16 sps:$4 sm:$0xff]  }
  0xda   :  { %2034 = vmatmul.mubr.bf16.gmra.mrb[12].mxu0 %v5870_v0  ;;  %2486 = vmatmul.mubr.bf16.gmra.mrb[12].mxu1 %v5870_v0  ;;  %v5927_v0 = vld [vmem:[%s7837_s0 + $0x130] ss:$28 sps:$4 sm:$0xff]  }
  0xdb   :  { %2043 = vmatprep.mubr.bf16.mxu0 %v5874_v1  ;;  %2495 = vmatprep.mubr.bf16.mxu1 %v5874_v1  ;;  %v5990_v1 = vld [vmem:[%s7838_s3 + $0x140] ss:$16 sps:$4 sm:$0xff]  }
  0xdc   :  { %2097 = vmatpush1.bf16.msra.mxu0 %v5901_v2  ;;  %2548 = vmatprep.subr.bf16.mxu1 %v5918_v3  ;;  %v5993_v2 = vld [vmem:[%s7838_s3 + $0x148] ss:$16 sps:$4 sm:$0xff]   ;;  %v5998_v3 = vld [vmem:[%s7838_s3 + $0x164] ss:$16 sps:$4 sm:$0xff]  }
  0xdd   :  { %2098 = vmatprep.subr.bf16.mxu0 %v5915_v4  ;;  %2549 = vmatpush1.bf16.msra.mxu1 %v5916_v5  ;;  %v6001_v4 = vld [vmem:[%s7838_s3 + $0x16c] ss:$16 sps:$4 sm:$0xff]   ;;  %v5996_v5 = vld [vmem:[%s7838_s3 + $0x160] ss:$16 sps:$4 sm:$0xff]  }
  0xde   :  { %2550 = vmatprep.subr.bf16.mxu1 %v5921_v6  ;;  %v5999_v6 = vld [vmem:[%s7838_s3 + $0x168] ss:$16 sps:$4 sm:$0xff]  }
  0xe0   :  { %2099 = vmatpush1.bf16.msra.mxu0 %v5913_v7  ;;  %v6004_v7 = vld [vmem:[%s7838_s3 + $0x184] ss:$16 sps:$4 sm:$0xff]  }
  0xe1   :  { %2551 = vmatpush1.bf16.msra.mxu1 %v5919_v8  ;;  %3535 = vmatprep.subr.bf16.mxu0 %v5932_v9  ;;  %v6007_v8 = vld [vmem:[%s7838_s3 + $0x18c] ss:$16 sps:$4 sm:$0xff]   ;;  %v5928_v9 = vld [vmem:[%s7837_s0 + $0x168] ss:$28 sps:$4 sm:$0xff]  }
  0xe2   :  { %2044 = vmatmul.mubr.bf16.gmra.mrb[16].mxu0 %v5876_v10  ;;  %2496 = vmatmul.mubr.bf16.gmra.mrb[16].mxu1 %v5876_v10  ;;  %v6002_v10 = vld [vmem:[%s7838_s3 + $0x180] ss:$16 sps:$4 sm:$0xff]  }
  0xe3   :  { %2053 = vmatprep.mubr.bf16.mxu0 %v5886_v11  ;;  %2505 = vmatprep.mubr.bf16.mxu1 %v5886_v11  ;;  %v6005_v11 = vld [vmem:[%s7838_s3 + $0x188] ss:$16 sps:$4 sm:$0xff]  }
  0xe4   :  { %3761 = vmatprep.subr.bf16.mxu1 %v5935_v12  ;;  %v6010_v12 = vld [vmem:[%s7838_s3 + $0x1a4] ss:$16 sps:$4 sm:$0xff]  }
  0xea   :  { %2054 = vmatmul.mubr.bf16.gmra.mrb[20].mxu0 %v5888_v13  ;;  %2506 = vmatmul.mubr.bf16.gmra.mrb[20].mxu1 %v5888_v13  ;;  %v6013_v13 = vld [vmem:[%s7838_s3 + $0x1ac] ss:$16 sps:$4 sm:$0xff]  }
  0xeb   :  { %2063 = vmatprep.mubr.bf16.mxu0 %v5898_v14  ;;  %2515 = vmatprep.mubr.bf16.mxu1 %v5898_v14  ;;  %v6008_v14 = vld [vmem:[%s7838_s3 + $0x1a0] ss:$16 sps:$4 sm:$0xff]  }
  0xf2   :  { %2064 = vmatmul.mubr.bf16.gmra.mrb[24].mxu0 %v5900_v15  ;;  %2516 = vmatmul.mubr.bf16.gmra.mrb[24].mxu1 %v5900_v15  ;;  %v6011_v15 = vld [vmem:[%s7838_s3 + $0x1a8] ss:$16 sps:$4 sm:$0xff]  }
  0xf3   :  { %2073 = vmatprep.mubr.bf16.mxu0 %v5910_v16  ;;  %2525 = vmatprep.mubr.bf16.mxu1 %v5910_v16  ;;  %v5929_v16 = vld [vmem:[%s7837_s0 + $0x1a0] ss:$28 sps:$4 sm:$0xff]  }
  0xfa   :  { %2074 = vmatmul.mubr.bf16.gmra.mrb[28].mxu0 %v5912_v17  ;;  %2526 = vmatmul.mubr.bf16.gmra.mrb[28].mxu1 %v5912_v17  ;;  %v6016_v17 = vld [vmem:[%s7838_s3 + $0x1c4] ss:$16 sps:$4 sm:$0xff]  }
  0xfb   :  { %2116 = vmatprep.mubr.bf16.mxu0 %v6154_v18  ;;  %2568 = vmatprep.mubr.bf16.mxu1 %v6154_v18 }
 0x102   :  { %2117 = vmatmul.mubr.bf16.vlgmr.msra.gmra.mrb[0].mxu0 %v5922_v19  ;;  %2569 = vmatmul.mubr.bf16.vlgmr.msra.gmra.mrb[0].mxu1 %v5922_v19  ;;  %v6014_v19 = vld [vmem:[%s7838_s3 + $0x1c0] ss:$16 sps:$4 sm:$0xff]  }
 0x103   :  { %2126 = vmatprep.mubr.bf16.mxu0 %v6154_v18  ;;  %2578 = vmatprep.mubr.bf16.mxu1 %v6154_v18 }
 0x104   :  { %3536 = vmatpush1.bf16.msra.mxu0 %v5930_v20  ;;  %3762 = vmatpush1.bf16.msra.mxu1 %v5933_v21  ;;  %v6017_v20 = vld [vmem:[%s7838_s3 + $0x1c8] ss:$16 sps:$4 sm:$0xff]   ;;  %v6022_v21 = vld [vmem:[%s7838_s3 + $0x1e4] ss:$16 sps:$4 sm:$0xff]  }
 0x105   :  { %3537 = vmatprep.subr.bf16.mxu0 %v5938_v22  ;;  %3763 = vmatprep.subr.bf16.mxu1 %v5941_v23  ;;  %v6025_v22 = vld [vmem:[%s7838_s3 + $0x1ec] ss:$16 sps:$4 sm:$0xff]   ;;  %v6020_v23 = vld [vmem:[%s7838_s3 + $0x1e0] ss:$16 sps:$4 sm:$0xff]  }
 0x108   :  { %3538 = vmatpush1.bf16.msra.mxu0 %v5936_v24  ;;  %3764 = vmatpush1.bf16.msra.mxu1 %v5939_v25  ;;  %v6023_v24 = vld [vmem:[%s7838_s3 + $0x1e8] ss:$16 sps:$4 sm:$0xff]   ;;  %v6028_v25 = vld [vmem:[%s7838_s3 + $0x204] ss:$16 sps:$4 sm:$0xff]  }
 0x109   :  { %3539 = vmatprep.subr.bf16.mxu0 %v5944_v26  ;;  %3765 = vmatprep.subr.bf16.mxu1 %v5947_v27  ;;  %v6031_v26 = vld [vmem:[%s7838_s3 + $0x20c] ss:$16 sps:$4 sm:$0xff]   ;;  %v317_v27 = vlaneseq }
 0x10a   :  { %2127 = vmatmul.mubr.bf16.gmra.mrb[4].mxu0 %v5923_v28  ;;  %2579 = vmatmul.mubr.bf16.gmra.mrb[4].mxu1 %v5923_v28 }
 0x10b   :  { %2136 = vmatprep.mubr.bf16.mxu0 %v6154_v18  ;;  %2588 = vmatprep.mubr.bf16.mxu1 %v6154_v18  ;;  %v7249_v28 = vshrl.u32 %v317_v27, 7 }
 0x10c   :  { %3540 = vmatpush1.bf16.msra.mxu0 %v5942_v29  ;;  %3766 = vmatpush1.bf16.msra.mxu1 %v5945_v30 }
 0x10d   :  { %3541 = vmatprep.subr.bf16.mxu0 %v5950_v31  ;;  %3767 = vmatprep.subr.bf16.mxu1 %v5953_v32  ;;  %v319_v29 = vsub.s32 0, %v7249_v28  ;;  %v327_v30 = vsub.s32 2, %v7249_v28  ;;  %v315_v31 = vld [vmem:[%s7839_s2] sm:$0xf]  ;;  %v323_v32 = vsub.s32 1, %v7249_v28 }
 0x110   :  { %3542 = vmatpush1.bf16.msra.mxu0 %v5948_v33  ;;  %3768 = vmatpush1.bf16.msra.mxu1 %v5951_v34  ;;  %v331_v33 = vsub.s32 3, %v7249_v28  ;;  %v7260_v34 = vrot.slane %v315_v31, %v319_v29 }
 0x111   :  { %3543 = vmatprep.subr.bf16.mxu0 %v5956_v35  ;;  %3769 = vmatprep.subr.bf16.mxu1 %v5959_v36  ;;  %v7264_v35 = vrot.slane %v315_v31, %v327_v30  ;;  %v7268_v36 = vrot.slane %v315_v31, %v323_v32 }
 0x112   :  { %2137 = vmatmul.mubr.bf16.gmra.mrb[8].mxu0 %v5924_v37  ;;  %2589 = vmatmul.mubr.bf16.gmra.mrb[8].mxu1 %v5924_v37  ;;  %v7272_v37 = vrot.slane %v315_v31, %v331_v33 }
 0x113   :  { %2146 = vmatprep.mubr.bf16.mxu0 %v6154_v18  ;;  %2598 = vmatprep.mubr.bf16.mxu1 %v6154_v18 }
 0x114   :  { %3544 = vmatpush1.bf16.msra.mxu0 %v5954_v38  ;;  %3770 = vmatpush1.bf16.msra.mxu1 %v5957_v39 }
 0x115   :  { %3545 = vmatprep.subr.bf16.mxu0 %v5962_v40  ;;  %3771 = vmatprep.subr.bf16.mxu1 %v5965_v41 }
 0x118   :  { %3546 = vmatpush1.bf16.msra.mxu0 %v5960_v42  ;;  %3772 = vmatpush1.bf16.msra.mxu1 %v5963_v43 }
 0x119   :  { %3547 = vmatprep.subr.bf16.mxu0 %v5968_v44  ;;  %3773 = vmatprep.subr.bf16.mxu1 %v5971_v45 }
 0x11a   :  { %2147 = vmatmul.mubr.bf16.gmra.mrb[12].mxu0 %v5925_v46  ;;  %2599 = vmatmul.mubr.bf16.gmra.mrb[12].mxu1 %v5925_v46 }
 0x11b   :  { %2156 = vmatprep.mubr.bf16.mxu0 %v6154_v18  ;;  %2608 = vmatprep.mubr.bf16.mxu1 %v6154_v18 }
 0x11c   :  { %3548 = vmatpush1.bf16.msra.mxu0 %v5966_v47  ;;  %3774 = vmatpush1.bf16.msra.mxu1 %v5969_v48 }
 0x11d   :  { %3549 = vmatprep.subr.bf16.mxu0 %v5974_v49  ;;  %3775 = vmatprep.subr.bf16.mxu1 %v5977_v50 }
 0x120   :  { %3550 = vmatpush1.bf16.msra.mxu0 %v5972_v51  ;;  %3776 = vmatpush1.bf16.msra.mxu1 %v5975_v52 }
 0x121   :  { %3551 = vmatprep.subr.bf16.mxu0 %v5980_v53  ;;  %3777 = vmatprep.subr.bf16.mxu1 %v5983_v54 }
 0x122   :  { %2157 = vmatmul.mubr.bf16.gmra.mrb[16].mxu0 %v5926_v55  ;;  %2609 = vmatmul.mubr.bf16.gmra.mrb[16].mxu1 %v5926_v55 }
 0x123   :  { %2166 = vmatprep.mubr.bf16.mxu0 %v6154_v18  ;;  %2618 = vmatprep.mubr.bf16.mxu1 %v6154_v18 }
 0x124   :  { %3552 = vmatpush1.bf16.msra.mxu0 %v5978_v56  ;;  %3778 = vmatpush1.bf16.msra.mxu1 %v5981_v57 }
 0x125   :  { %3553 = vmatprep.subr.bf16.mxu0 %v5986_v58  ;;  %3779 = vmatprep.subr.bf16.mxu1 %v5989_v59 }
 0x128   :  { %3554 = vmatpush1.bf16.msra.mxu0 %v5984_v60  ;;  %3780 = vmatpush1.bf16.msra.mxu1 %v5987_v61 }
 0x129   :  { %3555 = vmatprep.subr.bf16.mxu0 %v5992_v62  ;;  %3781 = vmatprep.subr.bf16.mxu1 %v5995_v63  ;;  %v6026_v62 = vld [vmem:[%s7838_s3 + $0x200] ss:$16 sps:$4 sm:$0xff]   ;;  %v6029_v63 = vld [vmem:[%s7838_s3 + $0x208] ss:$16 sps:$4 sm:$0xff]  }
 0x12a   :  { %2167 = vmatmul.mubr.bf16.gmra.mrb[20].mxu0 %v5927_v0  ;;  %2619 = vmatmul.mubr.bf16.gmra.mrb[20].mxu1 %v5927_v0 }
 0x12b   :  { %2176 = vmatprep.mubr.bf16.mxu0 %v6154_v18  ;;  %2628 = vmatprep.mubr.bf16.mxu1 %v6154_v18 }
 0x12c   :  { %3556 = vmatpush1.bf16.msra.mxu0 %v5990_v1  ;;  %3782 = vmatpush1.bf16.msra.mxu1 %v5993_v2  ;;  %v6034_v2 = vld [vmem:[%s7838_s3 + $0x224] ss:$16 sps:$4 sm:$0xff]  }
 0x12d   :  { %3557 = vmatprep.subr.bf16.mxu0 %v5998_v3  ;;  %3783 = vmatprep.subr.bf16.mxu1 %v6001_v4 }
 0x130   :  { %3558 = vmatpush1.bf16.msra.mxu0 %v5996_v5  ;;  %3784 = vmatpush1.bf16.msra.mxu1 %v5999_v6 }
 0x131   :  { %3559 = vmatprep.subr.bf16.mxu0 %v6004_v7  ;;  %3785 = vmatprep.subr.bf16.mxu1 %v6007_v8  ;;  %v6037_v7 = vld [vmem:[%s7838_s3 + $0x22c] ss:$16 sps:$4 sm:$0xff]  }
 0x132   :  { %2177 = vmatmul.mubr.bf16.gmra.mrb[24].mxu0 %v5928_v9  ;;  %2629 = vmatmul.mubr.bf16.gmra.mrb[24].mxu1 %v5928_v9 }
 0x133   :  { %2186 = vmatprep.mubr.bf16.mxu0 %v6154_v18  ;;  %2638 = vmatprep.mubr.bf16.mxu1 %v6154_v18  ;;  %v6019_v18 = vld [vmem:[%s7838_s3 + $0x1cc] ss:$16 sps:$4 sm:$0xff]  }
 0x134   :  { %3560 = vmatpush1.bf16.msra.mxu0 %v6002_v10  ;;  %3786 = vmatpush1.bf16.msra.mxu1 %v6005_v11 }
 0x135   :  { %3561 = vmatprep.subr.bf16.mxu0 %v6010_v12  ;;  %3787 = vmatprep.subr.bf16.mxu1 %v6013_v13 }
 0x138   :  { %3562 = vmatpush1.bf16.msra.mxu0 %v6008_v14  ;;  %3788 = vmatpush1.bf16.msra.mxu1 %v6011_v15 }
 0x139   :  { %3563 = vmatprep.subr.bf16.mxu0 %v6016_v17  ;;  %3789 = vmatprep.subr.bf16.mxu1 %v6019_v18  ;;  %v6035_v17 = vld [vmem:[%s7838_s3 + $0x228] ss:$16 sps:$4 sm:$0xff]  }
 0x13a   :  { %2187 = vmatmul.mubr.bf16.gmra.mrb[28].mxu0 %v5929_v16  ;;  %2639 = vmatmul.mubr.bf16.gmra.mrb[28].mxu1 %v5929_v16  ;;  %v6032_v16 = vld [vmem:[%s7838_s3 + $0x220] ss:$16 sps:$4 sm:$0xff]  }
 0x13c   :  { %3564 = vmatpush1.bf16.msra.mxu0 %v6014_v19  ;;  %3790 = vmatpush1.bf16.msra.mxu1 %v6017_v20 }
 0x13d   :  { %3565 = vmatprep.subr.bf16.mxu0 %v6022_v21  ;;  %3791 = vmatprep.subr.bf16.mxu1 %v6025_v22  ;;  %v6040_v22 = vld [vmem:[%s7838_s3 + $0x244] ss:$16 sps:$4 sm:$0xff]  }
 0x140   :  { %3566 = vmatpush1.bf16.msra.mxu0 %v6020_v23  ;;  %3792 = vmatpush1.bf16.msra.mxu1 %v6023_v24  ;;  %v6043_v23 = vld [vmem:[%s7838_s3 + $0x24c] ss:$16 sps:$4 sm:$0xff]  }
 0x141   :  { %3648 = vmatprep.subr.bf16.mxu0 %v6028_v25  ;;  %3874 = vmatprep.subr.bf16.mxu1 %v6031_v26 }
 0x1d5   :  { %v2118_v38 = vpop.f32.mrb[0].mxu0  ;;  %v2570_v39 = vpop.f32.mrb[0].mxu1 }
 0x1d6   :  { %v5129_v40 = vadd.f32 %v2118_v38, %v7260_v34  ;;  %v5161_v41 = vadd.f32 %v2570_v39, %v7264_v35  ;;  %v2120_v42 = vpop.f32.mrb[1].mxu0  ;;  %v2572_v43 = vpop.f32.mrb[1].mxu1 }
 0x1d7   :  { %v5130_v44 = vadd.f32 %v2120_v42, %v7268_v36  ;;  %v5162_v45 = vadd.f32 %v2572_v43, %v7272_v37  ;;  %v2122_v46 = vpop.f32.mrb[2].mxu0  ;;  %v2574_v47 = vpop.f32.mrb[2].mxu1  ;;  %v6038_v43 = vld [vmem:[%s7838_s3 + $0x240] ss:$16 sps:$4 sm:$0xff]  }
 0x1d8   :  { %v5131_v48 = vadd.f32 %v2122_v46, %v7260_v34  ;;  %v5163_v49 = vadd.f32 %v2574_v47, %v7264_v35  ;;  %v2124_v50 = vpop.f32.mrb[3].mxu0  ;;  %v2576_v51 = vpop.f32.mrb[3].mxu1  ;;  %v2649_v52 = vmax.f32 %v5129_v40, 0.0  ;;  %v2651_v53 = vmax.f32 %v5161_v41, 0.0  ;;  %v6046_v47 = vld [vmem:[%s7838_s3 + $0x264] ss:$16 sps:$4 sm:$0xff]  }
 0x1d9   :  { %v5132_v54 = vadd.f32 %v2124_v50, %v7268_v36  ;;  %v5164_v55 = vadd.f32 %v2576_v51, %v7272_v37  ;;  %v2650_v58 = vmax.f32 %v5130_v44, 0.0  ;;  %v2652_v59 = vmax.f32 %v5162_v45, 0.0  ;;  %v6041_v44 = vld [vmem:[%s7838_s3 + $0x248] ss:$16 sps:$4 sm:$0xff]  }
 0x1da   :  { %v2653_v56 = vmax.f32 %v5131_v48, 0.0  ;;  %v2655_v57 = vmax.f32 %v5163_v49, 0.0 }
 0x1db   :  { %v2654_v60 = vmax.f32 %v5132_v54, 0.0  ;;  %v2656_v61 = vmax.f32 %v5164_v55, 0.0 }
 0x1dc   :  { %v2713_v0 = vpack.c.bf16 %v2653_v56, %v2649_v52  ;;  %v7288_v1 = vpack.c.bf16 %v2655_v57, %v2651_v53  ;;  %v6049_v56 = vld [vmem:[%s7838_s3 + $0x26c] ss:$16 sps:$4 sm:$0xff]  }
 0x1dd   :  { %v2714_v3 = vpack.c.bf16 %v2654_v60, %v2650_v58  ;;  %v7293_v4 = vpack.c.bf16 %v2656_v61, %v2652_v59  ;;  %v2128_v5 = vpop.f32.mrb[4].mxu0  ;;  %v2580_v6 = vpop.f32.mrb[4].mxu1  ;;  %v6044_v61 = vld [vmem:[%s7838_s3 + $0x260] ss:$16 sps:$4 sm:$0xff]  }
 0x1de   :  { %v5133_v8 = vadd.f32 %v2128_v5, %v7260_v34  ;;  %v5165_v9 = vadd.f32 %v2580_v6, %v7264_v35  ;;  %v2130_v10 = vpop.f32.mrb[5].mxu0  ;;  %v2582_v11 = vpop.f32.mrb[5].mxu1  ;;  %v6052_v5 = vld [vmem:[%s7838_s3 + $0x284] ss:$16 sps:$4 sm:$0xff]  }
 0x1df   :  { %v5134_v12 = vadd.f32 %v2130_v10, %v7268_v36  ;;  %v5166_v13 = vadd.f32 %v2582_v11, %v7272_v37  ;;  %v2132_v14 = vpop.f32.mrb[6].mxu0  ;;  %v2584_v15 = vpop.f32.mrb[6].mxu1  ;;  %3567 = vmatprep.mubr.bf16.mxu0 %v2714_v3  ;;  %3793 = vmatprep.mubr.bf16.mxu1 %v2714_v3  ;;  %v6055_v10 = vld [vmem:[%s7838_s3 + $0x28c] ss:$16 sps:$4 sm:$0xff]  }
 0x1e0   :  { %v5135_v18 = vadd.f32 %v2132_v14, %v7260_v34  ;;  %v5167_v19 = vadd.f32 %v2584_v15, %v7264_v35  ;;  %v2134_v20 = vpop.f32.mrb[7].mxu0  ;;  %v2586_v21 = vpop.f32.mrb[7].mxu1  ;;  %3568 = vmatmul.mubr.bf16.vlgmr.msra.gmra.mrb[32].mxu0 %v2713_v0  ;;  %3794 = vmatmul.mubr.bf16.vlgmr.msra.gmra.mrb[32].mxu1 %v2713_v0  ;;  %v2657_v24 = vmax.f32 %v5133_v8, 0.0  ;;  %v2659_v25 = vmax.f32 %v5165_v9, 0.0 }
 0x1e1   :  { %v5136_v26 = vadd.f32 %v2134_v20, %v7268_v36  ;;  %v5168_v27 = vadd.f32 %v2586_v21, %v7272_v37  ;;  %3649 = vmatpush1.bf16.msra.mxu0 %v6026_v62  ;;  %3875 = vmatpush1.bf16.msra.mxu1 %v6029_v63  ;;  %v2658_v31 = vmax.f32 %v5134_v12, 0.0  ;;  %v2660_v38 = vmax.f32 %v5166_v13, 0.0  ;;  %v6047_v62 = vld [vmem:[%s7838_s3 + $0x268] ss:$16 sps:$4 sm:$0xff]   ;;  %v6058_v21 = vld [vmem:[%s7838_s3 + $0x2a4] ss:$16 sps:$4 sm:$0xff]  }
 0x1e2   :  { %v2661_v39 = vmax.f32 %v5135_v18, 0.0  ;;  %v2663_v40 = vmax.f32 %v5167_v19, 0.0  ;;  %3650 = vmatprep.subr.bf16.mxu0 %v6034_v2  ;;  %3876 = vmatprep.subr.bf16.mxu1 %v6037_v7  ;;  %v6053_v18 = vld [vmem:[%s7838_s3 + $0x288] ss:$16 sps:$4 sm:$0xff]  }
 0x1e3   :  { %v2662_v41 = vmax.f32 %v5136_v26, 0.0  ;;  %v2664_v42 = vmax.f32 %v5168_v27, 0.0  ;;  %v6061_v26 = vld [vmem:[%s7838_s3 + $0x2ac] ss:$16 sps:$4 sm:$0xff]  }
 0x1e4   :  { %v2717_v45 = vpack.c.bf16 %v2661_v39, %v2657_v24  ;;  %v7324_v46 = vpack.c.bf16 %v2663_v40, %v2659_v25 }
 0x1e5   :  { %v2718_v48 = vpack.c.bf16 %v2662_v41, %v2658_v31  ;;  %v7329_v49 = vpack.c.bf16 %v2664_v42, %v2660_v38  ;;  %v2138_v50 = vpop.f32.mrb[8].mxu0  ;;  %v2590_v51 = vpop.f32.mrb[8].mxu1  ;;  %3651 = vmatpush1.bf16.msra.mxu0 %v6032_v16  ;;  %3877 = vmatpush1.bf16.msra.mxu1 %v6035_v17  ;;  %v6050_v17 = vld [vmem:[%s7838_s3 + $0x280] ss:$16 sps:$4 sm:$0xff]  }
 0x1e6   :  { %v5137_v52 = vadd.f32 %v2138_v50, %v7260_v34  ;;  %v5169_v53 = vadd.f32 %v2590_v51, %v7264_v35  ;;  %v2140_v54 = vpop.f32.mrb[9].mxu0  ;;  %v2592_v55 = vpop.f32.mrb[9].mxu1  ;;  %3652 = vmatprep.subr.bf16.mxu0 %v6040_v22  ;;  %3878 = vmatprep.subr.bf16.mxu1 %v6043_v23 }
 0x1e7   :  { %v5138_v57 = vadd.f32 %v2140_v54, %v7268_v36  ;;  %v5170_v58 = vadd.f32 %v2592_v55, %v7272_v37  ;;  %v2142_v59 = vpop.f32.mrb[10].mxu0  ;;  %v2594_v60 = vpop.f32.mrb[10].mxu1  ;;  %3577 = vmatprep.mubr.bf16.mxu0 %v2718_v48  ;;  %3803 = vmatprep.mubr.bf16.mxu1 %v2718_v48 }
 0x1e8   :  { %v5139_v63 = vadd.f32 %v2142_v59, %v7260_v34  ;;  %v5171_v0 = vadd.f32 %v2594_v60, %v7264_v35  ;;  %v2144_v2 = vpop.f32.mrb[11].mxu0  ;;  %v2596_v3 = vpop.f32.mrb[11].mxu1  ;;  %3578 = vmatmul.mubr.bf16.gmra.mrb[36].mxu0 %v2717_v45  ;;  %3804 = vmatmul.mubr.bf16.gmra.mrb[36].mxu1 %v2717_v45  ;;  %v2665_v6 = vmax.f32 %v5137_v52, 0.0  ;;  %v2667_v7 = vmax.f32 %v5169_v53, 0.0  ;;  %v6059_v45 = vld [vmem:[%s7838_s3 + $0x2a8] ss:$16 sps:$4 sm:$0xff]  }
 0x1e9   :  { %v5140_v8 = vadd.f32 %v2144_v2, %v7268_v36  ;;  %v5172_v9 = vadd.f32 %v2596_v3, %v7272_v37  ;;  %3653 = vmatpush1.bf16.msra.mxu0 %v6038_v43  ;;  %3879 = vmatpush1.bf16.msra.mxu1 %v6041_v44  ;;  %v2666_v13 = vmax.f32 %v5138_v57, 0.0  ;;  %v2668_v14 = vmax.f32 %v5170_v58, 0.0  ;;  %v6056_v44 = vld [vmem:[%s7838_s3 + $0x2a0] ss:$16 sps:$4 sm:$0xff]   ;;  %v6064_v52 = vld [vmem:[%s7838_s3 + $0x2c4] ss:$16 sps:$4 sm:$0xff]  }
 0x1ea   :  { %v2669_v11 = vmax.f32 %v5139_v63, 0.0  ;;  %v2671_v12 = vmax.f32 %v5171_v0, 0.0  ;;  %3654 = vmatprep.subr.bf16.mxu0 %v6046_v47  ;;  %3880 = vmatprep.subr.bf16.mxu1 %v6049_v56  ;;  %v6067_v53 = vld [vmem:[%s7838_s3 + $0x2cc] ss:$16 sps:$4 sm:$0xff]   ;;  %v6062_v0 = vld [vmem:[%s7838_s3 + $0x2c0] ss:$16 sps:$4 sm:$0xff]  }
 0x1eb   :  { %v2670_v15 = vmax.f32 %v5140_v8, 0.0  ;;  %v2672_v16 = vmax.f32 %v5172_v9, 0.0  ;;  %v6065_v2 = vld [vmem:[%s7838_s3 + $0x2c8] ss:$16 sps:$4 sm:$0xff]  }
 0x1ec   :  { %v2721_v19 = vpack.c.bf16 %v2669_v11, %v2665_v6  ;;  %v7360_v20 = vpack.c.bf16 %v2671_v12, %v2667_v7  ;;  %v6070_v6 = vld [vmem:[%s7838_s3 + $0x2e4] ss:$16 sps:$4 sm:$0xff]   ;;  %v6073_v11 = vld [vmem:[%s7838_s3 + $0x2ec] ss:$16 sps:$4 sm:$0xff]  }
 0x1ed   :  { %v2722_v22 = vpack.c.bf16 %v2670_v15, %v2666_v13  ;;  %v7365_v23 = vpack.c.bf16 %v2672_v16, %v2668_v14  ;;  %v2148_v24 = vpop.f32.mrb[12].mxu0  ;;  %v2600_v25 = vpop.f32.mrb[12].mxu1  ;;  %3655 = vmatpush1.bf16.msra.mxu0 %v6044_v61  ;;  %3881 = vmatpush1.bf16.msra.mxu1 %v6047_v62 }
 0x1ee   :  { %v5141_v27 = vadd.f32 %v2148_v24, %v7260_v34  ;;  %v5173_v31 = vadd.f32 %v2600_v25, %v7264_v35  ;;  %v2150_v38 = vpop.f32.mrb[13].mxu0  ;;  %v2602_v39 = vpop.f32.mrb[13].mxu1  ;;  %3656 = vmatprep.subr.bf16.mxu0 %v6052_v5  ;;  %3882 = vmatprep.subr.bf16.mxu1 %v6055_v10 }
 0x1ef   :  { %v5142_v40 = vadd.f32 %v2150_v38, %v7268_v36  ;;  %v5174_v41 = vadd.f32 %v2602_v39, %v7272_v37  ;;  %v2152_v42 = vpop.f32.mrb[14].mxu0  ;;  %v2604_v43 = vpop.f32.mrb[14].mxu1  ;;  %3587 = vmatprep.mubr.bf16.mxu0 %v2722_v22  ;;  %3813 = vmatprep.mubr.bf16.mxu1 %v2722_v22  ;;  %v6071_v22 = vld [vmem:[%s7838_s3 + $0x2e8] ss:$16 sps:$4 sm:$0xff]   ;;  %v6079_v38 = vld [vmem:[%s7838_s3 + $0x30c] ss:$16 sps:$4 sm:$0xff]  }
 0x1f0   :  { %v5143_v47 = vadd.f32 %v2152_v42, %v7260_v34  ;;  %v5175_v48 = vadd.f32 %v2604_v43, %v7264_v35  ;;  %v2154_v50 = vpop.f32.mrb[15].mxu0  ;;  %v2606_v51 = vpop.f32.mrb[15].mxu1  ;;  %3588 = vmatmul.mubr.bf16.gmra.mrb[40].mxu0 %v2721_v19  ;;  %3814 = vmatmul.mubr.bf16.gmra.mrb[40].mxu1 %v2721_v19  ;;  %v2673_v54 = vmax.f32 %v5141_v27, 0.0  ;;  %v2675_v55 = vmax.f32 %v5173_v31, 0.0  ;;  %v6076_v31 = vld [vmem:[%s7838_s3 + $0x304] ss:$16 sps:$4 sm:$0xff]  }
 0x1f1   :  { %v5144_v56 = vadd.f32 %v2154_v50, %v7268_v36  ;;  %v5176_v57 = vadd.f32 %v2606_v51, %v7272_v37  ;;  %3657 = vmatpush1.bf16.msra.mxu0 %v6050_v17  ;;  %3883 = vmatpush1.bf16.msra.mxu1 %v6053_v18  ;;  %v2674_v60 = vmax.f32 %v5142_v40, 0.0  ;;  %v2676_v61 = vmax.f32 %v5174_v41, 0.0  ;;  %v6074_v51 = vld [vmem:[%s7838_s3 + $0x300] ss:$16 sps:$4 sm:$0xff]  }
 0x1f2   :  { %v2677_v58 = vmax.f32 %v5143_v47, 0.0  ;;  %v2679_v59 = vmax.f32 %v5175_v48, 0.0  ;;  %3658 = vmatprep.subr.bf16.mxu0 %v6058_v21  ;;  %3884 = vmatprep.subr.bf16.mxu1 %v6061_v26  ;;  %v6068_v21 = vld [vmem:[%s7838_s3 + $0x2e0] ss:$16 sps:$4 sm:$0xff]  }
 0x1f3   :  { %v2678_v62 = vmax.f32 %v5144_v56, 0.0  ;;  %v2680_v63 = vmax.f32 %v5176_v57, 0.0 }
 0x1f4   :  { %v2725_v3 = vpack.c.bf16 %v2677_v58, %v2673_v54  ;;  %v7396_v5 = vpack.c.bf16 %v2679_v59, %v2675_v55  ;;  %v6082_v55 = vld [vmem:[%s7838_s3 + $0x324] ss:$16 sps:$4 sm:$0xff]  }
 0x1f5   :  { %v2726_v7 = vpack.c.bf16 %v2678_v62, %v2674_v60  ;;  %v7401_v8 = vpack.c.bf16 %v2680_v63, %v2676_v61  ;;  %v2158_v9 = vpop.f32.mrb[16].mxu0  ;;  %v2610_v10 = vpop.f32.mrb[16].mxu1  ;;  %3659 = vmatpush1.bf16.msra.mxu0 %v6056_v44  ;;  %3885 = vmatpush1.bf16.msra.mxu1 %v6059_v45  ;;  %v6085_v60 = vld [vmem:[%s7838_s3 + $0x32c] ss:$16 sps:$4 sm:$0xff]  }
 0x1f6   :  { %v5145_v12 = vadd.f32 %v2158_v9, %v7260_v34  ;;  %v5177_v13 = vadd.f32 %v2610_v10, %v7264_v35  ;;  %v2160_v14 = vpop.f32.mrb[17].mxu0  ;;  %v2612_v15 = vpop.f32.mrb[17].mxu1  ;;  %3660 = vmatprep.subr.bf16.mxu0 %v6064_v52  ;;  %3886 = vmatprep.subr.bf16.mxu1 %v6067_v53  ;;  %v6077_v52 = vld [vmem:[%s7838_s3 + $0x308] ss:$16 sps:$4 sm:$0xff]   ;;  %v6080_v9 = vld [vmem:[%s7838_s3 + $0x320] ss:$16 sps:$4 sm:$0xff]  }
 0x1f7   :  { %v5146_v16 = vadd.f32 %v2160_v14, %v7268_v36  ;;  %v5178_v17 = vadd.f32 %v2612_v15, %v7272_v37  ;;  %v2162_v18 = vpop.f32.mrb[18].mxu0  ;;  %v2614_v19 = vpop.f32.mrb[18].mxu1  ;;  %3597 = vmatprep.mubr.bf16.mxu0 %v2726_v7  ;;  %3823 = vmatprep.mubr.bf16.mxu1 %v2726_v7  ;;  %v6083_v14 = vld [vmem:[%s7838_s3 + $0x328] ss:$16 sps:$4 sm:$0xff]  }
 0x1f8   :  { %v5147_v24 = vadd.f32 %v2162_v18, %v7260_v34  ;;  %v5179_v25 = vadd.f32 %v2614_v19, %v7264_v35  ;;  %v2164_v26 = vpop.f32.mrb[19].mxu0  ;;  %v2616_v27 = vpop.f32.mrb[19].mxu1  ;;  %3598 = vmatmul.mubr.bf16.gmra.mrb[44].mxu0 %v2725_v3  ;;  %3824 = vmatmul.mubr.bf16.gmra.mrb[44].mxu1 %v2725_v3  ;;  %v2681_v39 = vmax.f32 %v5145_v12, 0.0  ;;  %v2683_v40 = vmax.f32 %v5177_v13, 0.0 }
 0x1f9   :  { %v5148_v41 = vadd.f32 %v2164_v26, %v7268_v36  ;;  %v5180_v42 = vadd.f32 %v2616_v27, %v7272_v37  ;;  %3661 = vmatpush1.bf16.msra.mxu0 %v6062_v0  ;;  %3887 = vmatpush1.bf16.msra.mxu1 %v6065_v2  ;;  %v2682_v43 = vmax.f32 %v5146_v16, 0.0  ;;  %v2684_v44 = vmax.f32 %v5178_v17, 0.0  ;;  %v6088_v17 = vld [vmem:[%s7838_s3 + $0x344] ss:$16 sps:$4 sm:$0xff]  }
 0x1fa   :  { %v2685_v45 = vmax.f32 %v5147_v24, 0.0  ;;  %v2687_v47 = vmax.f32 %v5179_v25, 0.0  ;;  %3662 = vmatprep.subr.bf16.mxu0 %v6070_v6  ;;  %3888 = vmatprep.subr.bf16.mxu1 %v6073_v11  ;;  %v6091_v24 = vld [vmem:[%s7838_s3 + $0x34c] ss:$16 sps:$4 sm:$0xff]  }
 0x1fb   :  { %v2686_v48 = vmax.f32 %v5148_v41, 0.0  ;;  %v2688_v50 = vmax.f32 %v5180_v42, 0.0 }
 0x1fc   :  { %v2729_v53 = vpack.c.bf16 %v2685_v45, %v2681_v39  ;;  %v7432_v54 = vpack.c.bf16 %v2687_v47, %v2683_v40  ;;  %v6089_v45 = vld [vmem:[%s7838_s3 + $0x348] ss:$16 sps:$4 sm:$0xff]  }
 0x1fd   :  { %v2730_v56 = vpack.c.bf16 %v2686_v48, %v2682_v43  ;;  %v7437_v57 = vpack.c.bf16 %v2688_v50, %v2684_v44  ;;  %v2168_v58 = vpop.f32.mrb[20].mxu0  ;;  %v2620_v59 = vpop.f32.mrb[20].mxu1  ;;  %3663 = vmatpush1.bf16.msra.mxu0 %v6068_v21  ;;  %3889 = vmatpush1.bf16.msra.mxu1 %v6071_v22  ;;  %v6086_v44 = vld [vmem:[%s7838_s3 + $0x340] ss:$16 sps:$4 sm:$0xff]  }
 0x1fe   :  { %v5149_v61 = vadd.f32 %v2168_v58, %v7260_v34  ;;  %v5181_v62 = vadd.f32 %v2620_v59, %v7264_v35  ;;  %v2170_v63 = vpop.f32.mrb[21].mxu0  ;;  %v2622_v0 = vpop.f32.mrb[21].mxu1  ;;  %3664 = vmatprep.subr.bf16.mxu0 %v6076_v31  ;;  %3890 = vmatprep.subr.bf16.mxu1 %v6079_v38 }
 0x1ff   :  { %v5150_v2 = vadd.f32 %v2170_v63, %v7268_v36  ;;  %v5182_v3 = vadd.f32 %v2622_v0, %v7272_v37  ;;  %v2172_v6 = vpop.f32.mrb[22].mxu0  ;;  %v2624_v7 = vpop.f32.mrb[22].mxu1  ;;  %3607 = vmatprep.mubr.bf16.mxu0 %v2730_v56  ;;  %3833 = vmatprep.mubr.bf16.mxu1 %v2730_v56 }
 0x200   :  { %v5151_v10 = vadd.f32 %v2172_v6, %v7260_v34  ;;  %v5183_v11 = vadd.f32 %v2624_v7, %v7264_v35  ;;  %v2174_v12 = vpop.f32.mrb[23].mxu0  ;;  %v2626_v13 = vpop.f32.mrb[23].mxu1  ;;  %3608 = vmatmul.mubr.bf16.gmra.mrb[48].mxu0 %v2729_v53  ;;  %3834 = vmatmul.mubr.bf16.gmra.mrb[48].mxu1 %v2729_v53  ;;  %v2689_v18 = vmax.f32 %v5149_v61, 0.0  ;;  %v2691_v19 = vmax.f32 %v5181_v62, 0.0  ;;  %v6097_v53 = vld [vmem:[%s7838_s3 + $0x36c] ss:$16 sps:$4 sm:$0xff]  }
 0x201   :  { %v5152_v15 = vadd.f32 %v2174_v12, %v7268_v36  ;;  %v5184_v16 = vadd.f32 %v2626_v13, %v7272_v37  ;;  %3665 = vmatpush1.bf16.msra.mxu0 %v6074_v51  ;;  %3891 = vmatpush1.bf16.msra.mxu1 %v6077_v52  ;;  %v2690_v25 = vmax.f32 %v5150_v2, 0.0  ;;  %v2692_v26 = vmax.f32 %v5182_v3, 0.0  ;;  %v6094_v52 = vld [vmem:[%s7838_s3 + $0x364] ss:$16 sps:$4 sm:$0xff]   ;;  %v6092_v3 = vld [vmem:[%s7838_s3 + $0x360] ss:$16 sps:$4 sm:$0xff]  }
 0x202   :  { %v2693_v21 = vmax.f32 %v5151_v10, 0.0  ;;  %v2695_v22 = vmax.f32 %v5183_v11, 0.0  ;;  %3666 = vmatprep.subr.bf16.mxu0 %v6082_v55  ;;  %3892 = vmatprep.subr.bf16.mxu1 %v6085_v60  ;;  %v6095_v6 = vld [vmem:[%s7838_s3 + $0x368] ss:$16 sps:$4 sm:$0xff]   ;;  %v6100_v7 = vld [vmem:[%s7838_s3 + $0x384] ss:$16 sps:$4 sm:$0xff]  }
 0x203   :  { %v2694_v27 = vmax.f32 %v5152_v15, 0.0  ;;  %v2696_v31 = vmax.f32 %v5184_v16, 0.0  ;;  %v6103_v13 = vld [vmem:[%s7838_s3 + $0x38c] ss:$16 sps:$4 sm:$0xff]  }
 0x204   :  { %v2733_v38 = vpack.c.bf16 %v2693_v21, %v2689_v18  ;;  %v7462_v39 = vpack.c.bf16 %v2695_v22, %v2691_v19 }
 0x205   :  { %v2734_v40 = vpack.c.bf16 %v2694_v27, %v2690_v25  ;;  %v7464_v41 = vpack.c.bf16 %v2696_v31, %v2692_v26  ;;  %v2178_v42 = vpop.f32.mrb[24].mxu0  ;;  %v2630_v43 = vpop.f32.mrb[24].mxu1  ;;  %3667 = vmatpush1.bf16.msra.mxu0 %v6080_v9  ;;  %3893 = vmatpush1.bf16.msra.mxu1 %v6083_v14  ;;  %v6098_v26 = vld [vmem:[%s7838_s3 + $0x380] ss:$16 sps:$4 sm:$0xff]   ;;  %v6101_v27 = vld [vmem:[%s7838_s3 + $0x388] ss:$16 sps:$4 sm:$0xff]  }
 0x206   :  { %v5153_v47 = vadd.f32 %v2178_v42, %v7260_v34  ;;  %v5185_v48 = vadd.f32 %v2630_v43, %v7264_v35  ;;  %v2180_v50 = vpop.f32.mrb[25].mxu0  ;;  %v2632_v51 = vpop.f32.mrb[25].mxu1  ;;  %3668 = vmatprep.subr.bf16.mxu0 %v6088_v17  ;;  %3894 = vmatprep.subr.bf16.mxu1 %v6091_v24  ;;  %v6106_v43 = vld [vmem:[%s7838_s3 + $0x3a4] ss:$16 sps:$4 sm:$0xff]  }
 0x207   :  { %v5154_v55 = vadd.f32 %v2180_v50, %v7268_v36  ;;  %v5186_v56 = vadd.f32 %v2632_v51, %v7272_v37  ;;  %v2182_v58 = vpop.f32.mrb[26].mxu0  ;;  %v2634_v59 = vpop.f32.mrb[26].mxu1  ;;  %3617 = vmatprep.mubr.bf16.mxu0 %v2734_v40  ;;  %3843 = vmatprep.mubr.bf16.mxu1 %v2734_v40 }
 0x208   :  { %v5155_v60 = vadd.f32 %v2182_v58, %v7260_v34  ;;  %v5187_v61 = vadd.f32 %v2634_v59, %v7264_v35  ;;  %v2184_v62 = vpop.f32.mrb[27].mxu0  ;;  %v2636_v63 = vpop.f32.mrb[27].mxu1  ;;  %3618 = vmatmul.mubr.bf16.gmra.mrb[52].mxu0 %v2733_v38  ;;  %3844 = vmatmul.mubr.bf16.gmra.mrb[52].mxu1 %v2733_v38  ;;  %v2697_v9 = vmax.f32 %v5153_v47, 0.0  ;;  %v2699_v10 = vmax.f32 %v5185_v48, 0.0  ;;  %v6104_v59 = vld [vmem:[%s7838_s3 + $0x3a0] ss:$16 sps:$4 sm:$0xff]  }
 0x209   :  { %v5156_v0 = vadd.f32 %v2184_v62, %v7268_v36  ;;  %v5188_v2 = vadd.f32 %v2636_v63, %v7272_v37  ;;  %3669 = vmatpush1.bf16.msra.mxu0 %v6086_v44  ;;  %3895 = vmatpush1.bf16.msra.mxu1 %v6089_v45  ;;  %v2698_v14 = vmax.f32 %v5154_v55, 0.0  ;;  %v2700_v15 = vmax.f32 %v5186_v56, 0.0  ;;  %v6109_v44 = vld [vmem:[%s7838_s3 + $0x3ac] ss:$16 sps:$4 sm:$0xff]  }
 0x20a   :  { %v2701_v11 = vmax.f32 %v5155_v60, 0.0  ;;  %v2703_v12 = vmax.f32 %v5187_v61, 0.0  ;;  %3670 = vmatprep.subr.bf16.mxu0 %v6094_v52  ;;  %3896 = vmatprep.subr.bf16.mxu1 %v6097_v53 }
 0x20b   :  { %v2702_v16 = vmax.f32 %v5156_v0, 0.0  ;;  %v2704_v17 = vmax.f32 %v5188_v2, 0.0 }
 0x20c   :  { %v2737_v18 = vpack.c.bf16 %v2701_v11, %v2697_v9  ;;  %v7498_v19 = vpack.c.bf16 %v2703_v12, %v2699_v10  ;;  %v6110_v11 = vld [vmem:[%s7838_s3 + $0x3c0] ss:$16 sps:$4 sm:$0xff]   ;;  %v6113_v12 = vld [vmem:[%s7838_s3 + $0x3c8] ss:$16 sps:$4 sm:$0xff]  }
 0x20d   :  { %v2738_v21 = vpack.c.bf16 %v2702_v16, %v2698_v14  ;;  %v7500_v22 = vpack.c.bf16 %v2704_v17, %v2700_v15  ;;  %v2188_v24 = vpop.f32.mrb[28].mxu0  ;;  %v2640_v25 = vpop.f32.mrb[28].mxu1  ;;  %3671 = vmatpush1.bf16.msra.mxu0 %v6092_v3  ;;  %3897 = vmatpush1.bf16.msra.mxu1 %v6095_v6  ;;  %v6121_v14 = vld [vmem:[%s7838_s3 + $0x3ec] ss:$16 sps:$4 sm:$0xff]   ;;  %v6116_v15 = vld [vmem:[%s7838_s3 + $0x3e0] ss:$16 sps:$4 sm:$0xff]  }
 0x20e   :  { %v5157_v31 = vadd.f32 %v2188_v24, %v7260_v34  ;;  %v5189_v38 = vadd.f32 %v2640_v25, %v7264_v35  ;;  %v2190_v40 = vpop.f32.mrb[29].mxu0  ;;  %v2642_v42 = vpop.f32.mrb[29].mxu1  ;;  %3672 = vmatprep.subr.bf16.mxu0 %v6100_v7  ;;  %3898 = vmatprep.subr.bf16.mxu1 %v6103_v13  ;;  %v6118_v13 = vld [vmem:[%s7838_s3 + $0x3e4] ss:$16 sps:$4 sm:$0xff]   ;;  %v6119_v16 = vld [vmem:[%s7838_s3 + $0x3e8] ss:$16 sps:$4 sm:$0xff]  }
 0x20f   :  { %v5158_v45 = vadd.f32 %v2190_v40, %v7268_v36  ;;  %v5190_v47 = vadd.f32 %v2642_v42, %v7272_v37  ;;  %v2192_v48 = vpop.f32.mrb[30].mxu0  ;;  %v2644_v50 = vpop.f32.mrb[30].mxu1  ;;  %3627 = vmatprep.mubr.bf16.mxu0 %v2738_v21  ;;  %3853 = vmatprep.mubr.bf16.mxu1 %v2738_v21  ;;  %v6122_v17 = vld [vmem:[%s7840_s5 + $0x40] sm:$0xff]   ;;  %v6126_v24 = vld [vmem:[%s7840_s5 + $0x48] sm:$0xff]   ;;  %v6134_v40 = vld [vmem:[%s7840_s5 + $0x58] sm:$0xff]  }
 0x210   :  { %v5159_v51 = vadd.f32 %v2192_v48, %v7260_v34  ;;  %v5191_v52 = vadd.f32 %v2644_v50, %v7264_v35  ;;  %v2194_v53 = vpop.f32.mrb[31].mxu0  ;;  %v2646_v55 = vpop.f32.mrb[31].mxu1  ;;  %3628 = vmatmul.mubr.bf16.gmra.mrb[56].mxu0 %v2737_v18  ;;  %3854 = vmatmul.mubr.bf16.gmra.mrb[56].mxu1 %v2737_v18  ;;  %v6107_v34 = vld [vmem:[%s7838_s3 + $0x3a8] ss:$16 sps:$4 sm:$0xff]   ;;  %v6112_v35 = vld [vmem:[%s7838_s3 + $0x3c4] ss:$16 sps:$4 sm:$0xff]  }
 0x211   :  { %v5160_v56 = vadd.f32 %v2194_v53, %v7268_v36  ;;  %v5192_v58 = vadd.f32 %v2646_v55, %v7272_v37  ;;  %3673 = vmatpush1.bf16.msra.mxu0 %v6098_v26  ;;  %3899 = vmatpush1.bf16.msra.mxu1 %v6101_v27  ;;  %v2705_v60 = vmax.f32 %v5157_v31, 0.0  ;;  %v2707_v61 = vmax.f32 %v5189_v38, 0.0  ;;  %v6115_v37 = vld [vmem:[%s7838_s3 + $0x3cc] ss:$16 sps:$4 sm:$0xff]   ;;  %v6124_v18 = vld [vmem:[%s7840_s5 + $0xc0] sm:$0xff]   ;;  %v6130_v31 = vld [vmem:[%s7840_s5 + $0x50] sm:$0xff]  }
 0x212   :  { %v2709_v62 = vmax.f32 %v5159_v51, 0.0  ;;  %v2711_v36 = vmax.f32 %v5191_v52, 0.0  ;;  %3674 = vmatprep.subr.bf16.mxu0 %v6106_v43  ;;  %3900 = vmatprep.subr.bf16.mxu1 %v6109_v44  ;;  %v2706_v63 = vmax.f32 %v5158_v45, 0.0  ;;  %v2708_v0 = vmax.f32 %v5190_v47, 0.0  ;;  %v6125_v21 = vld [vmem:[%s7840_s5 + $0x80] sm:$0xff]   ;;  %v6128_v25 = vld [vmem:[%s7840_s5 + $0xc8] sm:$0xff]  }
 0x213   :  { %v2710_v2 = vmax.f32 %v5160_v56, 0.0  ;;  %v2712_v3 = vmax.f32 %v5192_v58, 0.0  ;;  %v6127_v26 = vld [vmem:[%s7840_s5 + $0x8] sm:$0xff]   ;;  %v6133_v38 = vld [vmem:[%s7840_s5 + $0x90] sm:$0xff]   ;;  %v6136_v42 = vld [vmem:[%s7840_s5 + $0xd8] sm:$0xff]  }
 0x214   :  { %v2741_v6 = vpack.c.bf16 %v2709_v62, %v2705_v60  ;;  %v7534_v7 = vpack.c.bf16 %v2711_v36, %v2707_v61  ;;  %v6129_v27 = vld [vmem:[%s7840_s5 + $0x88] sm:$0xff]   ;;  %v6135_v43 = vld [vmem:[%s7840_s5 + $0x18] sm:$0xff]   ;;  %v6138_v45 = vld [vmem:[%s7840_s5 + $0x60] sm:$0xff]  }
 0x215   :  { %v2742_v9 = vpack.c.bf16 %v2710_v2, %v2706_v63  ;;  %v7536_v10 = vpack.c.bf16 %v2712_v3, %v2708_v0  ;;  %3675 = vmatpush1.bf16.msra.mxu0 %v6104_v59  ;;  %3901 = vmatpush1.bf16.msra.mxu1 %v6107_v34  ;;  %v6137_v44 = vld [vmem:[%s7840_s5 + $0x98] sm:$0xff]   ;;  %v6141_v47 = vld [vmem:[%s7840_s5 + $0xa0] sm:$0xff]   ;;  %v6142_v48 = vld [vmem:[%s7840_s5 + $0x68] sm:$0xff]  }
 0x216   :  { %3676 = vmatprep.subr.bf16.mxu0 %v6112_v35  ;;  %3902 = vmatprep.subr.bf16.mxu1 %v6115_v37  ;;  %v6144_v50 = vld [vmem:[%s7840_s5 + $0xe8] sm:$0xff]   ;;  %v6146_v53 = vld [vmem:[%s7840_s5 + $0x70] sm:$0xff]  }
 0x217   :  { %3637 = vmatprep.mubr.bf16.mxu0 %v2742_v9  ;;  %3863 = vmatprep.mubr.bf16.mxu1 %v2742_v9  ;;  %v6143_v51 = vld [vmem:[%s7840_s5 + $0x28] sm:$0xff]   ;;  %v6149_v55 = vld [vmem:[%s7840_s5 + $0xb0] sm:$0xff]  }
 0x218   :  { %3638 = vmatmul.mubr.bf16.gmra.mrb[60].mxu0 %v2741_v6  ;;  %3864 = vmatmul.mubr.bf16.gmra.mrb[60].mxu1 %v2741_v6  ;;  %v6145_v52 = vld [vmem:[%s7840_s5 + $0xa8] sm:$0xff]  }
 0x219   :  { %3677 = vmatpush1.bf16.msra.mxu0 %v6110_v11  ;;  %3680 = vmatprep.mubr.bf16.mxu0 %v7293_v4 }
 0x21a   :  { %3903 = vmatpush1.bf16.msra.mxu1 %v6113_v12  ;;  %3906 = vmatprep.mubr.bf16.mxu1 %v7293_v4  ;;  %v6123_v4 = vld [vmem:[%s7840_s5] sm:$0xff]  }
 0x21b   :  { %3678 = vmatprep.subr.bf16.mxu0 %v6118_v13  ;;  %3904 = vmatprep.subr.bf16.mxu1 %v6121_v14 }
 0x21d   :  { %3679 = vmatpush1.bf16.msra.mxu0 %v6116_v15 }
 0x21e   :  { %3905 = vmatpush1.bf16.msra.mxu1 %v6119_v16  ;;  %5001 = vmatprep.subr.bf16.mxu0 %v6122_v17 }
 0x21f   :  { %5065 = vmatprep.subr.bf16.mxu1 %v6124_v18 }
 0x220   :  { %3681 = vmatmul.mubr.bf16.vlgmr.msra.gmra.mrb[32].mxu0 %v7288_v1 }
 0x221   :  { %3907 = vmatmul.mubr.bf16.vlgmr.msra.gmra.mrb[32].mxu1 %v7288_v1  ;;  %3690 = vmatprep.mubr.bf16.mxu0 %v7329_v49  ;;  %v6132_v1 = vld [vmem:[%s7840_s5 + $0xd0] sm:$0xff]  }
 0x222   :  { %3916 = vmatprep.mubr.bf16.mxu1 %v7329_v49  ;;  %5002 = vmatpush3.bf16.msra.mxu0 %v6123_v4  ;;  %v6131_v49 = vld [vmem:[%s7840_s5 + $0x10] sm:$0xff]  }
 0x223   :  { %5066 = vmatpush3.bf16.msra.mxu1 %v6125_v21  ;;  %5003 = vmatprep.subr.bf16.mxu0 %v6126_v24 }
 0x224   :  { %5067 = vmatprep.subr.bf16.mxu1 %v6128_v25 }
 0x226   :  { %5004 = vmatpush3.bf16.msra.mxu0 %v6127_v26 }
 0x227   :  { %5068 = vmatpush3.bf16.msra.mxu1 %v6129_v27  ;;  %5005 = vmatprep.subr.bf16.mxu0 %v6130_v31 }
 0x228   :  { %3691 = vmatmul.mubr.bf16.gmra.mrb[36].mxu0 %v7324_v46  ;;  %5069 = vmatprep.subr.bf16.mxu1 %v6132_v1 }
 0x229   :  { %3917 = vmatmul.mubr.bf16.gmra.mrb[36].mxu1 %v7324_v46  ;;  %3700 = vmatprep.mubr.bf16.mxu0 %v7365_v23  ;;  %v6140_v46 = vld [vmem:[%s7840_s5 + $0xe0] sm:$0xff]  }
 0x22a   :  { %3926 = vmatprep.mubr.bf16.mxu1 %v7365_v23  ;;  %5006 = vmatpush3.bf16.msra.mxu0 %v6131_v49  ;;  %v6139_v23 = vld [vmem:[%s7840_s5 + $0x20] sm:$0xff]  }
 0x22b   :  { %5070 = vmatpush3.bf16.msra.mxu1 %v6133_v38  ;;  %5007 = vmatprep.subr.bf16.mxu0 %v6134_v40 }
 0x22c   :  { %5071 = vmatprep.subr.bf16.mxu1 %v6136_v42 }
 0x22e   :  { %5008 = vmatpush3.bf16.msra.mxu0 %v6135_v43 }
 0x22f   :  { %5072 = vmatpush3.bf16.msra.mxu1 %v6137_v44  ;;  %5009 = vmatprep.subr.bf16.mxu0 %v6138_v45 }
 0x230   :  { %3701 = vmatmul.mubr.bf16.gmra.mrb[40].mxu0 %v7360_v20  ;;  %5073 = vmatprep.subr.bf16.mxu1 %v6140_v46 }
 0x231   :  { %3927 = vmatmul.mubr.bf16.gmra.mrb[40].mxu1 %v7360_v20  ;;  %3710 = vmatprep.mubr.bf16.mxu0 %v7401_v8  ;;  %v6148_v20 = vld [vmem:[%s7840_s5 + $0xf0] sm:$0xff]  }
 0x232   :  { %3936 = vmatprep.mubr.bf16.mxu1 %v7401_v8  ;;  %5010 = vmatpush3.bf16.msra.mxu0 %v6139_v23  ;;  %v6147_v8 = vld [vmem:[%s7840_s5 + $0x30] sm:$0xff]  }
 0x233   :  { %5074 = vmatpush3.bf16.msra.mxu1 %v6141_v47  ;;  %5011 = vmatprep.subr.bf16.mxu0 %v6142_v48 }
 0x234   :  { %5075 = vmatprep.subr.bf16.mxu1 %v6144_v50 }
 0x236   :  { %5012 = vmatpush3.bf16.msra.mxu0 %v6143_v51 }
 0x237   :  { %5076 = vmatpush3.bf16.msra.mxu1 %v6145_v52  ;;  %5013 = vmatprep.subr.bf16.mxu0 %v6146_v53 }
 0x238   :  { %3711 = vmatmul.mubr.bf16.gmra.mrb[44].mxu0 %v7396_v5  ;;  %5077 = vmatprep.subr.bf16.mxu1 %v6148_v20 }
 0x239   :  { %3937 = vmatmul.mubr.bf16.gmra.mrb[44].mxu1 %v7396_v5  ;;  %3720 = vmatprep.mubr.bf16.mxu0 %v7437_v57  ;;  %v6150_v5 = vld [vmem:[%s7840_s5 + $0x78] sm:$0xff]  }
 0x23a   :  { %3946 = vmatprep.mubr.bf16.mxu1 %v7437_v57  ;;  %5014 = vmatpush3.bf16.msra.mxu0 %v6147_v8  ;;  %v6151_v57 = vld [vmem:[%s7840_s5 + $0x38] sm:$0xff]  }
 0x23b   :  { %5078 = vmatpush3.bf16.msra.mxu1 %v6149_v55  ;;  %5015 = vmatprep.subr.bf16.mxu0 %v6150_v5 }
 0x23e   :  { %5016 = vmatpush3.bf16.msra.mxu0 %v6151_v57 }
 0x240   :  { %3721 = vmatmul.mubr.bf16.gmra.mrb[48].mxu0 %v7432_v54 }
 0x241   :  { %3947 = vmatmul.mubr.bf16.gmra.mrb[48].mxu1 %v7432_v54  ;;  %3730 = vmatprep.mubr.bf16.mxu0 %v7464_v41  ;;  %v6152_v54 = vld [vmem:[%s7840_s5 + $0xf8] sm:$0xff]  }
 0x242   :  { %3956 = vmatprep.mubr.bf16.mxu1 %v7464_v41  ;;  %5079 = vmatprep.subr.bf16.mxu1 %v6152_v54  ;;  %v2873_v41 = vld [vmem:[%s7841_s4] sm:$0xf] }
 0x243   :  { %v7697_v56 = vrot.slane %v2873_v41, %v323_v32  ;;  %v7701_v58 = vrot.slane %v2873_v41, %v331_v33 }
 0x248   :  { %3731 = vmatmul.mubr.bf16.gmra.mrb[52].mxu0 %v7462_v39 }
 0x249   :  { %3957 = vmatmul.mubr.bf16.gmra.mrb[52].mxu1 %v7462_v39  ;;  %3740 = vmatprep.mubr.bf16.mxu0 %v7500_v22  ;;  %v6153_v39 = vld [vmem:[%s7840_s5 + $0xb8] sm:$0xff]  }
 0x24a   :  { %3966 = vmatprep.mubr.bf16.mxu1 %v7500_v22  ;;  %5080 = vmatpush3.bf16.msra.mxu1 %v6153_v39  ;;  %v7693_v22 = vrot.slane %v2873_v41, %v327_v30 }
 0x250   :  { %3741 = vmatmul.mubr.bf16.gmra.mrb[56].mxu0 %v7498_v19 }
 0x251   :  { %3967 = vmatmul.mubr.bf16.gmra.mrb[56].mxu1 %v7498_v19  ;;  %3750 = vmatprep.mubr.bf16.mxu0 %v7536_v10  ;;  %v7689_v19 = vrot.slane %v2873_v41, %v319_v29 }
 0x252   :  { %3976 = vmatprep.mubr.bf16.mxu1 %v7536_v10 }
 0x258   :  { %3751 = vmatmul.mubr.bf16.gmra.mrb[60].mxu0 %v7534_v7 }
 0x259   :  { %3977 = vmatmul.mubr.bf16.gmra.mrb[60].mxu1 %v7534_v7 }
 0x2f3   :  { %v3682_v59 = vpop.f32.mrb[32].mxu0 }
 0x2f4   :  { %v5193_v34 = vadd.f32 %v3682_v59, %v7689_v19  ;;  %v3908_v35 = vpop.f32.mrb[32].mxu1  ;;  %v3684_v60 = vpop.f32.mrb[33].mxu0 }
 0x2f5   :  { %v5225_v29 = vadd.f32 %v3908_v35, %v7693_v22  ;;  %v5194_v61 = vadd.f32 %v3684_v60, %v7697_v56  ;;  %v3910_v62 = vpop.f32.mrb[33].mxu1  ;;  %v3686_v30 = vpop.f32.mrb[34].mxu0 }
 0x2f6   :  { %v5226_v36 = vadd.f32 %v3910_v62, %v7701_v58  ;;  %v5195_v32 = vadd.f32 %v3686_v30, %v7689_v19  ;;  %v3912_v37 = vpop.f32.mrb[34].mxu1  ;;  %v3688_v63 = vpop.f32.mrb[35].mxu0  ;;  %v3987_v2 = vmax.f32 %v5193_v34, 0.0 }
 0x2f7   :  { %v5227_v28 = vadd.f32 %v3912_v37, %v7693_v22  ;;  %v5196_v33 = vadd.f32 %v3688_v63, %v7697_v56  ;;  %v3914_v0 = vpop.f32.mrb[35].mxu1  ;;  %v3989_v7 = vmax.f32 %v5225_v29, 0.0  ;;  %v3988_v9 = vmax.f32 %v5194_v61, 0.0 }
 0x2f8   :  { %v3991_v3 = vmax.f32 %v5195_v32, 0.0  ;;  %v5228_v6 = vadd.f32 %v3914_v0, %v7701_v58  ;;  %v3990_v12 = vmax.f32 %v5226_v36, 0.0 }
 0x2f9   :  { %v3993_v10 = vmax.f32 %v5227_v28, 0.0  ;;  %v3992_v11 = vmax.f32 %v5196_v33, 0.0 }
 0x2fa   :  { %v4051_v13 = vpack.c.bf16 %v3991_v3, %v3987_v2  ;;  %v3994_v14 = vmax.f32 %v5228_v6, 0.0 }
 0x2fb   :  { %v4053_v15 = vpack.c.bf16 %v3993_v10, %v3989_v7  ;;  %v4052_v16 = vpack.c.bf16 %v3992_v11, %v3988_v9  ;;  %v3692_v17 = vpop.f32.mrb[36].mxu0 }
 0x2fc   :  { %v4054_v18 = vpack.c.bf16 %v3994_v14, %v3990_v12  ;;  %v5197_v4 = vadd.f32 %v3692_v17, %v7689_v19  ;;  %v3918_v21 = vpop.f32.mrb[36].mxu1  ;;  %v3694_v24 = vpop.f32.mrb[37].mxu0 }
 0x2fd   :  { %v5229_v25 = vadd.f32 %v3918_v21, %v7693_v22  ;;  %v5198_v26 = vadd.f32 %v3694_v24, %v7697_v56  ;;  %v3920_v27 = vpop.f32.mrb[37].mxu1  ;;  %v3696_v31 = vpop.f32.mrb[38].mxu0  ;;  %4378 = vmatprep.mubr.bf16.mxu0 %v4052_v16 }
 0x2fe   :  { %v5230_v1 = vadd.f32 %v3920_v27, %v7701_v58  ;;  %v5199_v49 = vadd.f32 %v3696_v31, %v7689_v19  ;;  %v3922_v38 = vpop.f32.mrb[38].mxu1  ;;  %4475 = vmatprep.mubr.bf16.mxu1 %v4054_v18  ;;  %v3698_v40 = vpop.f32.mrb[39].mxu0  ;;  %4379 = vmatmul.mubr.bf16.vlgmr.msra.gmra.mrb[64].mxu0 %v4051_v13  ;;  %v3995_v45 = vmax.f32 %v5197_v4, 0.0 }
 0x2ff   :  { %v5231_v42 = vadd.f32 %v3922_v38, %v7693_v22  ;;  %v5200_v43 = vadd.f32 %v3698_v40, %v7697_v56  ;;  %v3924_v44 = vpop.f32.mrb[39].mxu1  ;;  %4476 = vmatmul.mubr.bf16.vlgmr.msra.gmra.mrb[64].mxu1 %v4053_v15  ;;  %v3997_v47 = vmax.f32 %v5229_v25, 0.0  ;;  %v3996_v48 = vmax.f32 %v5198_v26, 0.0 }
 0x300   :  { %v3999_v46 = vmax.f32 %v5199_v49, 0.0  ;;  %v5232_v23 = vadd.f32 %v3924_v44, %v7701_v58  ;;  %v3998_v52 = vmax.f32 %v5230_v1, 0.0 }
 0x301   :  { %v4001_v50 = vmax.f32 %v5231_v42, 0.0  ;;  %v4000_v51 = vmax.f32 %v5200_v43, 0.0 }
 0x302   :  { %v4055_v53 = vpack.c.bf16 %v3999_v46, %v3995_v45  ;;  %v4002_v20 = vmax.f32 %v5232_v23, 0.0 }
 0x303   :  { %v4057_v8 = vpack.c.bf16 %v4001_v50, %v3997_v47  ;;  %v4056_v55 = vpack.c.bf16 %v4000_v51, %v3996_v48  ;;  %v3702_v5 = vpop.f32.mrb[40].mxu0 }
 0x304   :  { %v4058_v54 = vpack.c.bf16 %v4002_v20, %v3998_v52  ;;  %v5201_v57 = vadd.f32 %v3702_v5, %v7689_v19  ;;  %v3928_v39 = vpop.f32.mrb[40].mxu1  ;;  %v3704_v41 = vpop.f32.mrb[41].mxu0 }
 0x305   :  { %v5233_v59 = vadd.f32 %v3928_v39, %v7693_v22  ;;  %v5202_v34 = vadd.f32 %v3704_v41, %v7697_v56  ;;  %v3930_v35 = vpop.f32.mrb[41].mxu1  ;;  %v3706_v60 = vpop.f32.mrb[42].mxu0  ;;  %4386 = vmatprep.mubr.bf16.mxu0 %v4056_v55 }
 0x306   :  { %v5234_v29 = vadd.f32 %v3930_v35, %v7701_v58  ;;  %v5203_v61 = vadd.f32 %v3706_v60, %v7689_v19  ;;  %v3932_v62 = vpop.f32.mrb[42].mxu1  ;;  %4483 = vmatprep.mubr.bf16.mxu1 %v4058_v54  ;;  %v3708_v30 = vpop.f32.mrb[43].mxu0  ;;  %4387 = vmatmul.mubr.bf16.gmra.mrb[68].mxu0 %v4055_v53  ;;  %v4003_v63 = vmax.f32 %v5201_v57, 0.0 }
 0x307   :  { %v5235_v36 = vadd.f32 %v3932_v62, %v7693_v22  ;;  %v5204_v32 = vadd.f32 %v3708_v30, %v7697_v56  ;;  %v3934_v37 = vpop.f32.mrb[43].mxu1  ;;  %4484 = vmatmul.mubr.bf16.gmra.mrb[68].mxu1 %v4057_v8  ;;  %v4005_v0 = vmax.f32 %v5233_v59, 0.0  ;;  %v4004_v2 = vmax.f32 %v5202_v34, 0.0 }
 0x308   :  { %v4007_v28 = vmax.f32 %v5203_v61, 0.0  ;;  %v5236_v33 = vadd.f32 %v3934_v37, %v7701_v58  ;;  %v4006_v7 = vmax.f32 %v5234_v29, 0.0 }
 0x309   :  { %v4009_v3 = vmax.f32 %v5235_v36, 0.0  ;;  %v4008_v6 = vmax.f32 %v5204_v32, 0.0 }
 0x30a   :  { %v4059_v9 = vpack.c.bf16 %v4007_v28, %v4003_v63  ;;  %v4010_v10 = vmax.f32 %v5236_v33, 0.0 }
 0x30b   :  { %v4061_v11 = vpack.c.bf16 %v4009_v3, %v4005_v0  ;;  %v4060_v12 = vpack.c.bf16 %v4008_v6, %v4004_v2  ;;  %v3712_v13 = vpop.f32.mrb[44].mxu0 }
 0x30c   :  { %v4062_v14 = vpack.c.bf16 %v4010_v10, %v4006_v7  ;;  %v5205_v15 = vadd.f32 %v3712_v13, %v7689_v19  ;;  %v3938_v16 = vpop.f32.mrb[44].mxu1  ;;  %v3714_v17 = vpop.f32.mrb[45].mxu0 }
 0x30d   :  { %v5237_v18 = vadd.f32 %v3938_v16, %v7693_v22  ;;  %v5206_v4 = vadd.f32 %v3714_v17, %v7697_v56  ;;  %v3940_v21 = vpop.f32.mrb[45].mxu1  ;;  %v3716_v24 = vpop.f32.mrb[46].mxu0  ;;  %4394 = vmatprep.mubr.bf16.mxu0 %v4060_v12 }
 0x30e   :  { %v5238_v25 = vadd.f32 %v3940_v21, %v7701_v58  ;;  %v5207_v26 = vadd.f32 %v3716_v24, %v7689_v19  ;;  %v3942_v27 = vpop.f32.mrb[46].mxu1  ;;  %4491 = vmatprep.mubr.bf16.mxu1 %v4062_v14  ;;  %v3718_v31 = vpop.f32.mrb[47].mxu0  ;;  %4395 = vmatmul.mubr.bf16.gmra.mrb[72].mxu0 %v4059_v9  ;;  %v4011_v40 = vmax.f32 %v5205_v15, 0.0 }
 0x30f   :  { %v5239_v1 = vadd.f32 %v3942_v27, %v7693_v22  ;;  %v5208_v49 = vadd.f32 %v3718_v31, %v7697_v56  ;;  %v3944_v38 = vpop.f32.mrb[47].mxu1  ;;  %4492 = vmatmul.mubr.bf16.gmra.mrb[72].mxu1 %v4061_v11  ;;  %v4013_v44 = vmax.f32 %v5237_v18, 0.0  ;;  %v4012_v45 = vmax.f32 %v5206_v4, 0.0 }
 0x310   :  { %v4015_v42 = vmax.f32 %v5207_v26, 0.0  ;;  %v5240_v43 = vadd.f32 %v3944_v38, %v7701_v58  ;;  %v4014_v47 = vmax.f32 %v5238_v25, 0.0 }
 0x311   :  { %v4017_v46 = vmax.f32 %v5239_v1, 0.0  ;;  %v4016_v23 = vmax.f32 %v5208_v49, 0.0 }
 0x312   :  { %v4063_v48 = vpack.c.bf16 %v4015_v42, %v4011_v40  ;;  %v4018_v50 = vmax.f32 %v5240_v43, 0.0 }
 0x313   :  { %v4065_v51 = vpack.c.bf16 %v4017_v46, %v4013_v44  ;;  %v4064_v52 = vpack.c.bf16 %v4016_v23, %v4012_v45  ;;  %v3722_v53 = vpop.f32.mrb[48].mxu0 }
 0x314   :  { %v4066_v20 = vpack.c.bf16 %v4018_v50, %v4014_v47  ;;  %v5209_v8 = vadd.f32 %v3722_v53, %v7689_v19  ;;  %v3948_v55 = vpop.f32.mrb[48].mxu1  ;;  %v3724_v5 = vpop.f32.mrb[49].mxu0 }
 0x315   :  { %v5241_v54 = vadd.f32 %v3948_v55, %v7693_v22  ;;  %v5210_v57 = vadd.f32 %v3724_v5, %v7697_v56  ;;  %v3950_v39 = vpop.f32.mrb[49].mxu1  ;;  %v3726_v41 = vpop.f32.mrb[50].mxu0  ;;  %4402 = vmatprep.mubr.bf16.mxu0 %v4064_v52 }
 0x316   :  { %v5242_v59 = vadd.f32 %v3950_v39, %v7701_v58  ;;  %v5211_v34 = vadd.f32 %v3726_v41, %v7689_v19  ;;  %v3952_v35 = vpop.f32.mrb[50].mxu1  ;;  %4499 = vmatprep.mubr.bf16.mxu1 %v4066_v20  ;;  %v3728_v60 = vpop.f32.mrb[51].mxu0  ;;  %4403 = vmatmul.mubr.bf16.gmra.mrb[76].mxu0 %v4063_v48  ;;  %v4019_v30 = vmax.f32 %v5209_v8, 0.0 }
 0x317   :  { %v5243_v29 = vadd.f32 %v3952_v35, %v7693_v22  ;;  %v5212_v61 = vadd.f32 %v3728_v60, %v7697_v56  ;;  %v3954_v62 = vpop.f32.mrb[51].mxu1  ;;  %4500 = vmatmul.mubr.bf16.gmra.mrb[76].mxu1 %v4065_v51  ;;  %v4021_v37 = vmax.f32 %v5241_v54, 0.0  ;;  %v4020_v63 = vmax.f32 %v5210_v57, 0.0 }
 0x318   :  { %v4023_v36 = vmax.f32 %v5211_v34, 0.0  ;;  %v5244_v32 = vadd.f32 %v3954_v62, %v7701_v58  ;;  %v4022_v0 = vmax.f32 %v5242_v59, 0.0 }
 0x319   :  { %v4025_v28 = vmax.f32 %v5243_v29, 0.0  ;;  %v4024_v33 = vmax.f32 %v5212_v61, 0.0 }
 0x31a   :  { %v4067_v2 = vpack.c.bf16 %v4023_v36, %v4019_v30  ;;  %v4026_v3 = vmax.f32 %v5244_v32, 0.0 }
 0x31b   :  { %v4069_v6 = vpack.c.bf16 %v4025_v28, %v4021_v37  ;;  %v4068_v7 = vpack.c.bf16 %v4024_v33, %v4020_v63  ;;  %v3732_v9 = vpop.f32.mrb[52].mxu0 }
 0x31c   :  { %v4070_v10 = vpack.c.bf16 %v4026_v3, %v4022_v0  ;;  %v5213_v11 = vadd.f32 %v3732_v9, %v7689_v19  ;;  %v3958_v12 = vpop.f32.mrb[52].mxu1  ;;  %v3734_v13 = vpop.f32.mrb[53].mxu0 }
 0x31d   :  { %v5245_v14 = vadd.f32 %v3958_v12, %v7693_v22  ;;  %v5214_v15 = vadd.f32 %v3734_v13, %v7697_v56  ;;  %v3960_v16 = vpop.f32.mrb[53].mxu1  ;;  %v3736_v17 = vpop.f32.mrb[54].mxu0  ;;  %4410 = vmatprep.mubr.bf16.mxu0 %v4068_v7 }
 0x31e   :  { %v5246_v18 = vadd.f32 %v3960_v16, %v7701_v58  ;;  %v5215_v4 = vadd.f32 %v3736_v17, %v7689_v19  ;;  %v3962_v21 = vpop.f32.mrb[54].mxu1  ;;  %4507 = vmatprep.mubr.bf16.mxu1 %v4070_v10  ;;  %v3738_v24 = vpop.f32.mrb[55].mxu0  ;;  %4411 = vmatmul.mubr.bf16.gmra.mrb[80].mxu0 %v4067_v2  ;;  %v4027_v31 = vmax.f32 %v5213_v11, 0.0 }
 0x31f   :  { %v5247_v25 = vadd.f32 %v3962_v21, %v7693_v22  ;;  %v5216_v26 = vadd.f32 %v3738_v24, %v7697_v56  ;;  %v3964_v27 = vpop.f32.mrb[55].mxu1  ;;  %4508 = vmatmul.mubr.bf16.gmra.mrb[80].mxu1 %v4069_v6  ;;  %v4029_v38 = vmax.f32 %v5245_v14, 0.0  ;;  %v4028_v40 = vmax.f32 %v5214_v15, 0.0 }
 0x320   :  { %v4031_v1 = vmax.f32 %v5215_v4, 0.0  ;;  %v5248_v49 = vadd.f32 %v3964_v27, %v7701_v58  ;;  %v4030_v44 = vmax.f32 %v5246_v18, 0.0 }
 0x321   :  { %v4033_v42 = vmax.f32 %v5247_v25, 0.0  ;;  %v4032_v43 = vmax.f32 %v5216_v26, 0.0 }
 0x322   :  { %v4071_v45 = vpack.c.bf16 %v4031_v1, %v4027_v31  ;;  %v4034_v46 = vmax.f32 %v5248_v49, 0.0 }
 0x323   :  { %v4073_v23 = vpack.c.bf16 %v4033_v42, %v4029_v38  ;;  %v4072_v47 = vpack.c.bf16 %v4032_v43, %v4028_v40  ;;  %v3742_v48 = vpop.f32.mrb[56].mxu0 }
 0x324   :  { %v4074_v50 = vpack.c.bf16 %v4034_v46, %v4030_v44  ;;  %v5217_v51 = vadd.f32 %v3742_v48, %v7689_v19  ;;  %v3968_v52 = vpop.f32.mrb[56].mxu1  ;;  %v3744_v53 = vpop.f32.mrb[57].mxu0 }
 0x325   :  { %v5249_v20 = vadd.f32 %v3968_v52, %v7693_v22  ;;  %v5218_v8 = vadd.f32 %v3744_v53, %v7697_v56  ;;  %v3970_v55 = vpop.f32.mrb[57].mxu1  ;;  %v3746_v5 = vpop.f32.mrb[58].mxu0  ;;  %4418 = vmatprep.mubr.bf16.mxu0 %v4072_v47 }
 0x326   :  { %v5250_v54 = vadd.f32 %v3970_v55, %v7701_v58  ;;  %v5219_v57 = vadd.f32 %v3746_v5, %v7689_v19  ;;  %v3972_v39 = vpop.f32.mrb[58].mxu1  ;;  %4515 = vmatprep.mubr.bf16.mxu1 %v4074_v50  ;;  %v3748_v41 = vpop.f32.mrb[59].mxu0  ;;  %4419 = vmatmul.mubr.bf16.gmra.mrb[84].mxu0 %v4071_v45  ;;  %v4035_v60 = vmax.f32 %v5217_v51, 0.0 }
 0x327   :  { %v5251_v59 = vadd.f32 %v3972_v39, %v7693_v22  ;;  %v5220_v34 = vadd.f32 %v3748_v41, %v7697_v56  ;;  %v3974_v35 = vpop.f32.mrb[59].mxu1  ;;  %4516 = vmatmul.mubr.bf16.gmra.mrb[84].mxu1 %v4073_v23  ;;  %v4037_v62 = vmax.f32 %v5249_v20, 0.0  ;;  %v4036_v30 = vmax.f32 %v5218_v8, 0.0 }
 0x328   :  { %v4039_v29 = vmax.f32 %v5219_v57, 0.0  ;;  %v5252_v61 = vadd.f32 %v3974_v35, %v7701_v58  ;;  %v4038_v37 = vmax.f32 %v5250_v54, 0.0 }
 0x329   :  { %v4041_v36 = vmax.f32 %v5251_v59, 0.0  ;;  %v4040_v32 = vmax.f32 %v5220_v34, 0.0 }
 0x32a   :  { %v4075_v63 = vpack.c.bf16 %v4039_v29, %v4035_v60  ;;  %v4042_v28 = vmax.f32 %v5252_v61, 0.0 }
 0x32b   :  { %v4077_v33 = vpack.c.bf16 %v4041_v36, %v4037_v62  ;;  %v4076_v0 = vpack.c.bf16 %v4040_v32, %v4036_v30  ;;  %v3752_v2 = vpop.f32.mrb[60].mxu0 }
 0x32c   :  { %v4078_v3 = vpack.c.bf16 %v4042_v28, %v4038_v37  ;;  %v5221_v6 = vadd.f32 %v3752_v2, %v7689_v19  ;;  %v3978_v7 = vpop.f32.mrb[60].mxu1  ;;  %v3754_v9 = vpop.f32.mrb[61].mxu0 }
 0x32d   :  { %v5253_v10 = vadd.f32 %v3978_v7, %v7693_v22  ;;  %v5222_v11 = vadd.f32 %v3754_v9, %v7697_v56  ;;  %v3980_v12 = vpop.f32.mrb[61].mxu1  ;;  %v3756_v13 = vpop.f32.mrb[62].mxu0  ;;  %4426 = vmatprep.mubr.bf16.mxu0 %v4076_v0 }
 0x32e   :  { %v5254_v14 = vadd.f32 %v3980_v12, %v7701_v58  ;;  %v5223_v15 = vadd.f32 %v3756_v13, %v7689_v19  ;;  %v3982_v16 = vpop.f32.mrb[62].mxu1  ;;  %4523 = vmatprep.mubr.bf16.mxu1 %v4078_v3  ;;  %v3758_v17 = vpop.f32.mrb[63].mxu0  ;;  %4427 = vmatmul.mubr.bf16.gmra.mrb[88].mxu0 %v4075_v63  ;;  %v4043_v24 = vmax.f32 %v5221_v6, 0.0 }
 0x32f   :  { %v5255_v18 = vadd.f32 %v3982_v16, %v7693_v22  ;;  %v5224_v4 = vadd.f32 %v3758_v17, %v7697_v56  ;;  %v3984_v21 = vpop.f32.mrb[63].mxu1  ;;  %4524 = vmatmul.mubr.bf16.gmra.mrb[88].mxu1 %v4077_v33  ;;  %v4045_v27 = vmax.f32 %v5253_v10, 0.0  ;;  %v4044_v31 = vmax.f32 %v5222_v11, 0.0 }
 0x330   :  { %v4047_v25 = vmax.f32 %v5223_v15, 0.0  ;;  %v5256_v26 = vadd.f32 %v3984_v21, %v7701_v58  ;;  %v4046_v38 = vmax.f32 %v5254_v14, 0.0  ;;  %v7770_v58 = vld [vmem:[%s7842_s6] ss:$0 sm:$0xff] }
 0x331   :  { %v4049_v1 = vmax.f32 %v5255_v18, 0.0  ;;  %v4048_v49 = vmax.f32 %v5224_v4, 0.0 }
 0x332   :  { %v4079_v19 = vpack.c.bf16 %v4047_v25, %v4043_v24  ;;  %v4050_v40 = vmax.f32 %v5256_v26, 0.0 }
 0x333   :  { %v4081_v42 = vpack.c.bf16 %v4049_v1, %v4045_v27  ;;  %v4080_v43 = vpack.c.bf16 %v4048_v49, %v4044_v31 }
 0x334   :  { %v4082_v44 = vpack.c.bf16 %v4050_v40, %v4046_v38 }
 0x335   :  { %4434 = vmatprep.mubr.bf16.mxu0 %v4080_v43 }
 0x336   :  { %4531 = vmatprep.mubr.bf16.mxu1 %v4082_v44  ;;  %4435 = vmatmul.mubr.bf16.gmra.mrb[92].mxu0 %v4079_v19 }
 0x337   :  { %4532 = vmatmul.mubr.bf16.gmra.mrb[92].mxu1 %v4081_v42 }
 0x3d1   :  { %v5017_v22 = vpop.f32.mrb[64].mxu0 }
 0x3d2   :  { %v5081_v56 = vpop.f32.mrb[64].mxu1  ;;  %v5018_v45 = vpop.f32.mrb[65].mxu0 }
 0x3d3   :  { %v5019_v46 = vadd.f32 %v5018_v45, %v5017_v22  ;;  %v5082_v23 = vpop.f32.mrb[65].mxu1  ;;  %v5020_v47 = vpop.f32.mrb[66].mxu0 }
 0x3d4   :  { %v5083_v48 = vadd.f32 %v5082_v23, %v5081_v56  ;;  %v5084_v50 = vpop.f32.mrb[66].mxu1  ;;  %v5021_v51 = vpop.f32.mrb[67].mxu0 }
 0x3d5   :  { %v4381_v52 = vadd.f32 %v5019_v46, %v7770_v58  ;;  %v5022_v53 = vadd.f32 %v5021_v51, %v5020_v47  ;;  %v5085_v20 = vpop.f32.mrb[67].mxu1 }
 0x3d6   :  { %v5086_v8 = vadd.f32 %v5085_v20, %v5084_v50 }
 0x3d7   :  { %v4478_v55 = vadd.f32 %v5083_v48, %v4381_v52  ;;  %v4384_v5 = vadd.f32 %v5022_v53, %v7770_v58 }
 0x3d9   :  { %4540 = vst [vmem:[%s7843_s7] sm:$0xff] %v4478_v55  ;;  %v4481_v54 = vadd.f32 %v5086_v8, %v4384_v5  ;;  %v5023_v57 = vpop.f32.mrb[68].mxu0 }
 0x3da   :  { %v5087_v39 = vpop.f32.mrb[68].mxu1  ;;  %v5024_v41 = vpop.f32.mrb[69].mxu0 }
 0x3db   :  { %4541 = vst [vmem:[%s7843_s7 + $0x8] sm:$0xff] %v4481_v54  ;;  %v5025_v59 = vadd.f32 %v5024_v41, %v5023_v57  ;;  %v5088_v34 = vpop.f32.mrb[69].mxu1  ;;  %v5026_v35 = vpop.f32.mrb[70].mxu0 }
 0x3dc   :  { %v5089_v60 = vadd.f32 %v5088_v34, %v5087_v39  ;;  %v5090_v29 = vpop.f32.mrb[70].mxu1  ;;  %v5027_v61 = vpop.f32.mrb[71].mxu0 }
 0x3dd   :  { %v4389_v62 = vadd.f32 %v5025_v59, %v7770_v58  ;;  %v5028_v30 = vadd.f32 %v5027_v61, %v5026_v35  ;;  %v5091_v36 = vpop.f32.mrb[71].mxu1 }
 0x3de   :  { %v5092_v32 = vadd.f32 %v5091_v36, %v5090_v29 }
 0x3df   :  { %v4486_v37 = vadd.f32 %v5089_v60, %v4389_v62  ;;  %v4392_v63 = vadd.f32 %v5028_v30, %v7770_v58 }
 0x3e1   :  { %4542 = vst [vmem:[%s7843_s7 + $0x10] sm:$0xff] %v4486_v37  ;;  %v4489_v28 = vadd.f32 %v5092_v32, %v4392_v63  ;;  %v5029_v33 = vpop.f32.mrb[72].mxu0 }
 0x3e2   :  { %v5093_v0 = vpop.f32.mrb[72].mxu1  ;;  %v5030_v2 = vpop.f32.mrb[73].mxu0 }
 0x3e3   :  { %4543 = vst [vmem:[%s7843_s7 + $0x18] sm:$0xff] %v4489_v28  ;;  %v5031_v3 = vadd.f32 %v5030_v2, %v5029_v33  ;;  %v5094_v6 = vpop.f32.mrb[73].mxu1  ;;  %v5032_v7 = vpop.f32.mrb[74].mxu0 }
 0x3e4   :  { %v5095_v9 = vadd.f32 %v5094_v6, %v5093_v0  ;;  %v5096_v10 = vpop.f32.mrb[74].mxu1  ;;  %v5033_v11 = vpop.f32.mrb[75].mxu0 }
 0x3e5   :  { %v4397_v12 = vadd.f32 %v5031_v3, %v7770_v58  ;;  %v5034_v13 = vadd.f32 %v5033_v11, %v5032_v7  ;;  %v5097_v14 = vpop.f32.mrb[75].mxu1 }
 0x3e6   :  { %v5098_v15 = vadd.f32 %v5097_v14, %v5096_v10 }
 0x3e7   :  { %v4494_v16 = vadd.f32 %v5095_v9, %v4397_v12  ;;  %v4400_v17 = vadd.f32 %v5034_v13, %v7770_v58 }
 0x3e9   :  { %4544 = vst [vmem:[%s7843_s7 + $0x20] sm:$0xff] %v4494_v16  ;;  %v4497_v18 = vadd.f32 %v5098_v15, %v4400_v17  ;;  %v5035_v4 = vpop.f32.mrb[76].mxu0 }
 0x3ea   :  { %v5099_v21 = vpop.f32.mrb[76].mxu1  ;;  %v5036_v24 = vpop.f32.mrb[77].mxu0 }
 0x3eb   :  { %4545 = vst [vmem:[%s7843_s7 + $0x28] sm:$0xff] %v4497_v18  ;;  %v5037_v25 = vadd.f32 %v5036_v24, %v5035_v4  ;;  %v5100_v26 = vpop.f32.mrb[77].mxu1  ;;  %v5038_v27 = vpop.f32.mrb[78].mxu0 }
 0x3ec   :  { %v5101_v31 = vadd.f32 %v5100_v26, %v5099_v21  ;;  %v5102_v1 = vpop.f32.mrb[78].mxu1  ;;  %v5039_v49 = vpop.f32.mrb[79].mxu0 }
 0x3ed   :  { %v4405_v38 = vadd.f32 %v5037_v25, %v7770_v58  ;;  %v5040_v19 = vadd.f32 %v5039_v49, %v5038_v27  ;;  %v5103_v40 = vpop.f32.mrb[79].mxu1 }
 0x3ee   :  { %v5104_v42 = vadd.f32 %v5103_v40, %v5102_v1 }
 0x3ef   :  { %v4502_v43 = vadd.f32 %v5101_v31, %v4405_v38  ;;  %v4408_v44 = vadd.f32 %v5040_v19, %v7770_v58 }
 0x3f1   :  { %4546 = vst [vmem:[%s7843_s7 + $0x30] sm:$0xff] %v4502_v43  ;;  %v4505_v22 = vadd.f32 %v5104_v42, %v4408_v44  ;;  %v5041_v56 = vpop.f32.mrb[80].mxu0 }
 0x3f2   :  { %v5105_v45 = vpop.f32.mrb[80].mxu1  ;;  %v5042_v46 = vpop.f32.mrb[81].mxu0 }
 0x3f3   :  { %4547 = vst [vmem:[%s7843_s7 + $0x38] sm:$0xff] %v4505_v22  ;;  %v5043_v23 = vadd.f32 %v5042_v46, %v5041_v56  ;;  %v5106_v47 = vpop.f32.mrb[81].mxu1  ;;  %v5044_v48 = vpop.f32.mrb[82].mxu0 }
 0x3f4   :  { %v5107_v50 = vadd.f32 %v5106_v47, %v5105_v45  ;;  %v5108_v51 = vpop.f32.mrb[82].mxu1  ;;  %v5045_v52 = vpop.f32.mrb[83].mxu0 }
 0x3f5   :  { %v4413_v53 = vadd.f32 %v5043_v23, %v7770_v58  ;;  %v5046_v20 = vadd.f32 %v5045_v52, %v5044_v48  ;;  %v5109_v8 = vpop.f32.mrb[83].mxu1 }
 0x3f6   :  { %v5110_v55 = vadd.f32 %v5109_v8, %v5108_v51 }
 0x3f7   :  { %v4510_v5 = vadd.f32 %v5107_v50, %v4413_v53  ;;  %v4416_v54 = vadd.f32 %v5046_v20, %v7770_v58 }
 0x3f9   :  { %4548 = vst [vmem:[%s7843_s7 + $0x40] sm:$0xff] %v4510_v5  ;;  %v4513_v57 = vadd.f32 %v5110_v55, %v4416_v54  ;;  %v5047_v39 = vpop.f32.mrb[84].mxu0 }
 0x3fa   :  { %v5111_v41 = vpop.f32.mrb[84].mxu1  ;;  %v5048_v59 = vpop.f32.mrb[85].mxu0 }
 0x3fb   :  { %4549 = vst [vmem:[%s7843_s7 + $0x48] sm:$0xff] %v4513_v57  ;;  %v5049_v34 = vadd.f32 %v5048_v59, %v5047_v39  ;;  %v5112_v35 = vpop.f32.mrb[85].mxu1  ;;  %v5050_v60 = vpop.f32.mrb[86].mxu0 }
 0x3fc   :  { %v5113_v29 = vadd.f32 %v5112_v35, %v5111_v41  ;;  %v5114_v61 = vpop.f32.mrb[86].mxu1  ;;  %v5051_v62 = vpop.f32.mrb[87].mxu0 }
 0x3fd   :  { %v4421_v30 = vadd.f32 %v5049_v34, %v7770_v58  ;;  %v5052_v36 = vadd.f32 %v5051_v62, %v5050_v60  ;;  %v5115_v32 = vpop.f32.mrb[87].mxu1 }
 0x3fe   :  { %v5116_v37 = vadd.f32 %v5115_v32, %v5114_v61 }
 0x3ff   :  { %v4518_v63 = vadd.f32 %v5113_v29, %v4421_v30  ;;  %v4424_v28 = vadd.f32 %v5052_v36, %v7770_v58 }
 0x401   :  { %4550 = vst [vmem:[%s7843_s7 + $0x50] sm:$0xff] %v4518_v63  ;;  %v4521_v33 = vadd.f32 %v5116_v37, %v4424_v28  ;;  %v5053_v0 = vpop.f32.mrb[88].mxu0 }
 0x402   :  { %v5117_v2 = vpop.f32.mrb[88].mxu1  ;;  %v5054_v3 = vpop.f32.mrb[89].mxu0 }
 0x403   :  { %4551 = vst [vmem:[%s7843_s7 + $0x58] sm:$0xff] %v4521_v33  ;;  %v5055_v6 = vadd.f32 %v5054_v3, %v5053_v0  ;;  %v5118_v7 = vpop.f32.mrb[89].mxu1  ;;  %v5056_v9 = vpop.f32.mrb[90].mxu0 }
 0x404   :  { %v5119_v10 = vadd.f32 %v5118_v7, %v5117_v2  ;;  %v5120_v11 = vpop.f32.mrb[90].mxu1  ;;  %v5057_v12 = vpop.f32.mrb[91].mxu0 }
 0x405   :  { %v4429_v13 = vadd.f32 %v5055_v6, %v7770_v58  ;;  %v5058_v14 = vadd.f32 %v5057_v12, %v5056_v9  ;;  %v5121_v15 = vpop.f32.mrb[91].mxu1 }
 0x406   :  { %v5122_v16 = vadd.f32 %v5121_v15, %v5120_v11 }
 0x407   :  { %v4526_v17 = vadd.f32 %v5119_v10, %v4429_v13  ;;  %v4432_v18 = vadd.f32 %v5058_v14, %v7770_v58 }
 0x409   :  { %4552 = vst [vmem:[%s7843_s7 + $0x60] sm:$0xff] %v4526_v17  ;;  %v4529_v4 = vadd.f32 %v5122_v16, %v4432_v18  ;;  %v5059_v21 = vpop.f32.mrb[92].mxu0 }
 0x40a   :  { %v5123_v24 = vpop.f32.mrb[92].mxu1  ;;  %v5060_v25 = vpop.f32.mrb[93].mxu0 }
 0x40b   :  { %4553 = vst [vmem:[%s7843_s7 + $0x68] sm:$0xff] %v4529_v4  ;;  %v5061_v26 = vadd.f32 %v5060_v25, %v5059_v21  ;;  %v5124_v27 = vpop.f32.mrb[93].mxu1  ;;  %v5062_v31 = vpop.f32.mrb[94].mxu0 }
 0x40c   :  { %v5125_v1 = vadd.f32 %v5124_v27, %v5123_v24  ;;  %v5126_v49 = vpop.f32.mrb[94].mxu1  ;;  %v5063_v38 = vpop.f32.mrb[95].mxu0 }
 0x40d   :  { %v4437_v19 = vadd.f32 %v5061_v26, %v7770_v58  ;;  %v5064_v40 = vadd.f32 %v5063_v38, %v5062_v31  ;;  %v5127_v42 = vpop.f32.mrb[95].mxu1 }
 0x40e   :  { %v5128_v43 = vadd.f32 %v5127_v42, %v5126_v49 }
 0x40f   :  { %v4534_v44 = vadd.f32 %v5125_v1, %v4437_v19  ;;  %v4440_v22 = vadd.f32 %v5064_v40, %v7770_v58 }
 0x411   :  { %4554 = vst [vmem:[%s7843_s7 + $0x70] sm:$0xff] %v4534_v44  ;;  %v4537_v56 = vadd.f32 %v5128_v43, %v4440_v22 }
 0x413   :  { %4555 = vst [vmem:[%s7843_s7 + $0x78] sm:$0xff] %v4537_v56 }

</bundles_post_ra>
